<compile_context>
chip_gen: v7x
topology: tpu7x:2x2x1
jax: 0.10.0
libtpu: 0.0.40
codegen_flags: <defaults>
</compile_context>

<pallas_src>
import functools

import jax
import jax.numpy as jnp
from jax.experimental import pallas as pl
from jax.experimental.pallas import tpu as pltpu


def _round_up(x, m):
    return (x + m - 1) // m * m


def _plan_tiles(n, tm=256, tk=2048):
    """Pick (N_pad, TM, TK) so that TM | N_pad and TK | N_pad."""
    if n <= tk:
        n_pad = _round_up(max(n, 256), 256)
        tk = n_pad
    else:
        n_pad = _round_up(n, tk)
    tm = min(tm, n_pad)
    return n_pad, tm, tk


def _gcn_layer_kernel(a_ref, f_ref, w_ref, b_ref, o_ref, acc_ref, *,
                      activation, valid_cols):
    """One GCN layer: out = act( (A @ F) @ W + b ) for one (TM, O_pad) row tile."""
    k = pl.program_id(1)

    @pl.when(k == 0)
    def _init():
        acc_ref[...] = jnp.zeros_like(acc_ref)

    # Stream A_hat (bf16) against the feature panel; accumulate A @ F in f32.
    acc_ref[...] += jnp.dot(a_ref[...], f_ref[...],
                            preferred_element_type=jnp.float32)

    @pl.when(k == pl.num_programs(1) - 1)
    def _epilogue():
        # (A @ F) @ W + b  ==  A @ (F @ W) + b; W applied once per row tile.
        z = jnp.dot(acc_ref[...], w_ref[...],
                    preferred_element_type=jnp.float32,
                    precision=jax.lax.Precision.HIGHEST) + b_ref[...]
        if activation == "relu":
            o_ref[...] = jnp.maximum(z, 0.0).astype(o_ref.dtype)
        else:  # masked log-softmax over the first `valid_cols` lanes
            lane = jax.lax.broadcasted_iota(jnp.int32, z.shape, dimension=1)
            valid = lane < valid_cols
            neg = jnp.float32(-1e30)
            zm = jnp.where(valid, z, neg)
            m = jnp.max(zm, axis=1, keepdims=True)
            s = zm - m
            lse = jnp.log(jnp.sum(jnp.where(valid, jnp.exp(s), 0.0),
                                  axis=1, keepdims=True))
            o_ref[...] = jnp.where(valid, s - lse, 0.0).astype(o_ref.dtype)


def _gcn_layer(a_p, f_p, w_p, b_p, *, tm, tk, activation, valid_cols,
               out_dtype):
    n_pad = a_p.shape[0]
    f_dim = f_p.shape[1]
    o_dim = w_p.shape[1]
    grid = (n_pad // tm, n_pad // tk)

    flops = 2 * n_pad * n_pad * f_dim + 2 * n_pad * f_dim * o_dim
    bytes_accessed = (a_p.size * a_p.dtype.itemsize
                      + grid[0] * f_p.size * f_p.dtype.itemsize
                      + w_p.size * 4 + b_p.size * 4
                      + n_pad * o_dim * jnp.dtype(out_dtype).itemsize)
    transcendentals = n_pad * o_dim if activation == "log_softmax" else 0

    kernel = functools.partial(_gcn_layer_kernel,
                               activation=activation, valid_cols=valid_cols)
    return pl.pallas_call(
        kernel,
        out_shape=jax.ShapeDtypeStruct((n_pad, o_dim), out_dtype),
        grid=grid,
        in_specs=[
            pl.BlockSpec((tm, tk), lambda i, k: (i, k)),        # A_hat tile
            pl.BlockSpec((tk, f_dim), lambda i, k: (k, 0)),     # feature panel
            pl.BlockSpec((f_dim, o_dim), lambda i, k: (0, 0)),  # W (resident)
            pl.BlockSpec((1, o_dim), lambda i, k: (0, 0)),      # bias (resident)
        ],
        out_specs=pl.BlockSpec((tm, o_dim), lambda i, k: (i, 0)),
        scratch_shapes=[pltpu.VMEM((tm, o_dim), jnp.float32)],
        compiler_params=pltpu.CompilerParams(
            dimension_semantics=("parallel", "arbitrary"),
            vmem_limit_bytes=48 * 1024 * 1024),
        cost_estimate=pl.CostEstimate(flops=flops,
                                      transcendentals=transcendentals,
                                      bytes_accessed=bytes_accessed),
    )(a_p, f_p, w_p, b_p)


def gnn_forward(a_hat, x, w1, b1, w2, b2):
    """Full 2-layer GCN forward. a_hat: [N,N] f32, x: [N,F_in] f32."""
    n, f_in = x.shape
    h_dim = w1.shape[1]
    f_out = w2.shape[1]

    n_pad, tm, tk = _plan_tiles(n)
    f_in_p = _round_up(f_in, 128)
    h_p = _round_up(h_dim, 128)
    o_p = _round_up(f_out, 128)

    # Zero-padded, lane-aligned operands; A_hat and X stream as bf16.
    a_p = jnp.zeros((n_pad, n_pad), jnp.bfloat16).at[:n, :n].set(
        a_hat.astype(jnp.bfloat16))
    x_p = jnp.zeros((n_pad, f_in_p), jnp.bfloat16).at[:n, :f_in].set(
        x.astype(jnp.bfloat16))
    w1_p = jnp.zeros((f_in_p, h_p), jnp.float32).at[:f_in, :h_dim].set(w1)
    b1_p = jnp.zeros((1, h_p), jnp.float32).at[:, :h_dim].set(b1)
    w2_p = jnp.zeros((h_p, o_p), jnp.float32).at[:h_dim, :f_out].set(w2)
    b2_p = jnp.zeros((1, o_p), jnp.float32).at[:, :f_out].set(b2)

    # Layer 1: h = relu(A_hat @ X @ W1 + b1), stored as bf16 (halves its stream).
    h = _gcn_layer(a_p, x_p, w1_p, b1_p, tm=tm, tk=tk,
                   activation="relu", valid_cols=h_dim,
                   out_dtype=jnp.bfloat16)

    # Dropout: F.dropout(x, training=self.training) — eval mode => identity.
    # TODO(synk): training-mode dropout (pltpu.prng_random_bits mask) not wired in.

    # Layer 2: log_softmax(A_hat @ h @ W2 + b2) over the first f_out lanes.
    z = _gcn_layer(a_p, h, w2_p, b2_p, tm=tm, tk=tk,
                   activation="log_softmax", valid_cols=f_out,
                   out_dtype=jnp.float32)
    return z[:n, :f_out]


def gcn_normalized_adjacency(edge_index, num_nodes):
    """Dense A_hat = D^{-1/2} (A + I) D^{-1/2}, PyG gcn_norm convention."""
    src = edge_index[0]
    dst = edge_index[1]
    a = jnp.zeros((num_nodes, num_nodes), dtype=jnp.float32)
    a = a.at[dst, src].add(1.0)
    a = a + jnp.eye(num_nodes, dtype=jnp.float32)
    deg = a.sum(axis=1)                      # in-degree incl. self-loop
    dinv = 1.0 / jnp.sqrt(deg)
    return dinv[:, None] * a * dinv[None, :]


def gnn_reference(a_hat, x, w1, b1, w2, b2):
    """Pure-JAX reference with the same bf16 quantization of A, X, h."""
    hp = jax.lax.Precision.HIGHEST
    a = a_hat.astype(jnp.bfloat16).astype(jnp.float32)
    xq = x.astype(jnp.bfloat16).astype(jnp.float32)
    h = jnp.maximum(jnp.dot(a, jnp.dot(xq, w1, precision=hp), precision=hp)
                    + b1, 0.0)
    h = h.astype(jnp.bfloat16).astype(jnp.float32)
    z = jnp.dot(a, jnp.dot(h, w2, precision=hp), precision=hp) + b2
    return jax.nn.log_softmax(z, axis=1)


if __name__ == "__main__":
    # Data from the PyTorch script (4 nodes, 3 features each).
    edge_index = jnp.array([[0, 1, 2, 3, 2],
                            [1, 0, 3, 2, 1]], dtype=jnp.int32)
    node_features = jnp.array([[1, 2, 3],
                               [4, 5, 6],
                               [7, 8, 9],
                               [10, 11, 12]], dtype=jnp.float32)

    num_nodes, input_dim = node_features.shape   # 4, 3
    hidden_dim = 16
    output_dim = 2                               # binary labels {0, 1}

    # Deterministic parameter init (glorot-like scaling).
    key = jax.random.PRNGKey(0)
    k1, k2 = jax.random.split(key)
    w1 = (jax.random.normal(k1, (input_dim, hidden_dim), dtype=jnp.float32)
          * (1.0 / jnp.sqrt(input_dim)))
    b1 = jnp.zeros((1, hidden_dim), dtype=jnp.float32)
    w2 = (jax.random.normal(k2, (hidden_dim, output_dim), dtype=jnp.float32)
          * (1.0 / jnp.sqrt(hidden_dim)))
    b2 = jnp.zeros((1, output_dim), dtype=jnp.float32)

    a_hat = gcn_normalized_adjacency(edge_index, num_nodes)

    out = gnn_forward(a_hat, node_features, w1, b1, w2, b2)
    out = jax.block_until_ready(out)

    # Sanity: shape, finiteness, log-probs exponentiate and sum to 1 per node.
    assert out.shape == (num_nodes, output_dim)
    assert bool(jnp.all(jnp.isfinite(out)))
    row_sums = jnp.exp(out).sum(axis=1)
    assert jnp.allclose(row_sums, jnp.ones_like(row_sums), atol=1e-4)

    # Cross-check against a pure-JAX reference (same bf16 quantization).
    ref = gnn_reference(a_hat, node_features, w1, b1, w2, b2)
    assert jnp.allclose(out, ref, atol=5e-2), (out, ref)

    print("KERNEL_OK")
</pallas_src>

<mosaic_0001>
module attributes {stable_mosaic.version = 11 : i64} {
  func.func @_gcn_layer_kernel(%arg0: i32, %arg1: i32, %arg2: memref<256x256xbf16, #tpu.memory_space<vmem>>, %arg3: memref<256x128xbf16, #tpu.memory_space<vmem>>, %arg4: memref<128x128xf32, #tpu.memory_space<vmem>>, %arg5: memref<1x128xf32, #tpu.memory_space<vmem>>, %arg6: memref<256x128xbf16, #tpu.memory_space<vmem>>, %arg7: memref<256x128xf32, #tpu.memory_space<vmem>>) attributes {dimension_semantics = [#tpu.dimension_semantics<parallel>, #tpu.dimension_semantics<arbitrary>], iteration_bounds = array<i64: 1, 1>, scalar_prefetch = 0 : i64, scratch_operands = 1 : i64, tpu.core_type = #tpu.core_type<tc>, window_params = [{transform_indices = @transform_0, window_bounds = array<i64: 256, 256>}, {transform_indices = @transform_1, window_bounds = array<i64: 256, 128>}, {pipeline_mode = #tpu.pipeline_mode<synchronous>, transform_indices = @transform_2, window_bounds = array<i64: 128, 128>}, {pipeline_mode = #tpu.pipeline_mode<synchronous>, transform_indices = @transform_3, window_bounds = array<i64: 1, 128>}, {transform_indices = @transform_4, window_bounds = array<i64: 256, 128>}]} {
    %c0_i32 = arith.constant 0 : i32
    %0 = arith.cmpi eq, %arg1, %c0_i32 : i32
    %1 = arith.extui %0 : i1 to i32
    %c0_i32_0 = arith.constant 0 : i32
    %2 = arith.cmpi ne, %1, %c0_i32_0 : i32
    scf.if %2 {
      %cst_10 = arith.constant 0.000000e+00 : f32
      %12 = vector.broadcast %cst_10 : f32 to vector<256x128xf32>
      %c0_11 = arith.constant 0 : index
      %c0_12 = arith.constant 0 : index
      %13 = vector.load %arg7[%c0_11, %c0_12] : memref<256x128xf32, #tpu.memory_space<vmem>>, vector<256x128xf32>
      tpu.vector_store %arg7[%c0_11, %c0_12], %12 {strides = array<i32>} : memref<256x128xf32, #tpu.memory_space<vmem>>, vector<256x128xf32>,
    } else {
    }
    %c0 = arith.constant 0 : index
    %c0_1 = arith.constant 0 : index
    %3 = vector.load %arg7[%c0, %c0_1] : memref<256x128xf32, #tpu.memory_space<vmem>>, vector<256x128xf32>
    %c0_2 = arith.constant 0 : index
    %c0_3 = arith.constant 0 : index
    %4 = vector.load %arg2[%c0_2, %c0_3] : memref<256x256xbf16, #tpu.memory_space<vmem>>, vector<256x256xbf16>
    %c0_4 = arith.constant 0 : index
    %c0_5 = arith.constant 0 : index
    %5 = vector.load %arg3[%c0_4, %c0_5] : memref<256x128xbf16, #tpu.memory_space<vmem>>, vector<256x128xbf16>
    %cst = arith.constant dense<0.000000e+00> : vector<256x128xf32>
    %6 = tpu.matmul %4, %5, %cst {dimension_numbers = #tpu.dot_dimension_numbers<[1], [0], [0], [1], [0, 0, 1, 1], [], []>} : vector<256x256xbf16>, vector<256x128xbf16>, vector<256x128xf32> -> vector<256x128xf32>
    %7 = arith.addf %3, %6 : vector<256x128xf32>
    %c0_6 = arith.constant 0 : index
    %c0_7 = arith.constant 0 : index
    %8 = vector.load %arg7[%c0_6, %c0_7] : memref<256x128xf32, #tpu.memory_space<vmem>>, vector<256x128xf32>
    tpu.vector_store %arg7[%c0_6, %c0_7], %7 {strides = array<i32>} : memref<256x128xf32, #tpu.memory_space<vmem>>, vector<256x128xf32>,
    %c0_i32_8 = arith.constant 0 : i32
    %9 = arith.cmpi eq, %arg1, %c0_i32_8 : i32
    %10 = arith.extui %9 : i1 to i32
    %c0_i32_9 = arith.constant 0 : i32
    %11 = arith.cmpi ne, %10, %c0_i32_9 : i32
    scf.if %11 {
      %c0_10 = arith.constant 0 : index
      %c0_11 = arith.constant 0 : index
      %12 = vector.load %arg7[%c0_10, %c0_11] : memref<256x128xf32, #tpu.memory_space<vmem>>, vector<256x128xf32>
      %c0_12 = arith.constant 0 : index
      %c0_13 = arith.constant 0 : index
      %13 = vector.load %arg4[%c0_12, %c0_13] : memref<128x128xf32, #tpu.memory_space<vmem>>, vector<128x128xf32>
      %cst_14 = arith.constant dense<0.000000e+00> : vector<256x128xf32>
      %14 = tpu.matmul %12, %13, %cst_14 {dimension_numbers = #tpu.dot_dimension_numbers<[1], [0], [0], [1], [0, 0, 1, 1], [], []>, precision = #tpu.contract_precision<fp32>} : vector<256x128xf32>, vector<128x128xf32>, vector<256x128xf32> -> vector<256x128xf32>
      %c0_15 = arith.constant 0 : index
      %c0_16 = arith.constant 0 : index
      %15 = vector.load %arg5[%c0_15, %c0_16] : memref<1x128xf32, #tpu.memory_space<vmem>>, vector<1x128xf32>
      %16 = vector.broadcast %15 : vector<1x128xf32> to vector<256x128xf32>
      %17 = arith.addf %14, %16 : vector<256x128xf32>
      %cst_17 = arith.constant 0.000000e+00 : f32
      %18 = vector.broadcast %cst_17 : f32 to vector<256x128xf32>
      %19 = arith.maximumf %17, %18 : vector<256x128xf32>
      %20 = arith.truncf %19 : vector<256x128xf32> to vector<256x128xbf16>
      %c0_18 = arith.constant 0 : index
      %c0_19 = arith.constant 0 : index
      %21 = vector.load %arg6[%c0_18, %c0_19] : memref<256x128xbf16, #tpu.memory_space<vmem>>, vector<256x128xbf16>
      tpu.vector_store %arg6[%c0_18, %c0_19], %20 {strides = array<i32>} : memref<256x128xbf16, #tpu.memory_space<vmem>>, vector<256x128xbf16>,
    } else {
    }
    return
  }
  func.func @transform_0(%arg0: i32, %arg1: i32) -> (i32, i32) {
    %c0_i32 = arith.constant 0 : i32
    return %arg0, %arg1 : i32, i32
  }
  func.func @transform_1(%arg0: i32, %arg1: i32) -> (i32, i32) {
    %c0_i32 = arith.constant 0 : i32
    %c0_i32_0 = arith.constant 0 : i32
    return %arg1, %c0_i32 : i32, i32
  }
  func.func @transform_2(%arg0: i32, %arg1: i32) -> (i32, i32) {
    %c0_i32 = arith.constant 0 : i32
    %c0_i32_0 = arith.constant 0 : i32
    %c0_i32_1 = arith.constant 0 : i32
    return %c0_i32, %c0_i32_0 : i32, i32
  }
  func.func @transform_3(%arg0: i32, %arg1: i32) -> (i32, i32) {
    %c0_i32 = arith.constant 0 : i32
    %c0_i32_0 = arith.constant 0 : i32
    %c0_i32_1 = arith.constant 0 : i32
    return %c0_i32, %c0_i32_0 : i32, i32
  }
  func.func @transform_4(%arg0: i32, %arg1: i32) -> (i32, i32) {
    %c0_i32 = arith.constant 0 : i32
    %c0_i32_0 = arith.constant 0 : i32
    return %arg0, %c0_i32 : i32, i32
  }
}

</mosaic_0001>

<bundles_post_ra>
// kernel: tpu_custom_call.1
= control target key start
LH: loop header
LB: loop body
LE: loop exit
PB: predicated region body
PF: predicated region fallthrough
CT: control target
= control target key end

     0   :  { %9 = vsyncpa [#allocation4], 0  ;;  %s5451_s0 = inlined_call_operand.hbm [shape: bf16[256,256], index: 0, kind: input, shape index: {}]   ;;  %s5452_s1 = inlined_call_operand.hbm [shape: bf16[256,128], index: 1, kind: input, shape index: {}]   ;;  %s5453_s2 = inlined_call_operand.hbm [shape: f32[128,128], index: 2, kind: input, shape index: {}]   ;;  %s5454_s3 = inlined_call_operand.vmem [shape: f32[1,128], index: 3, kind: input, shape index: {}]   ;;  %s5455_s4 = inlined_call_operand.hbm [shape: bf16[256,128], index: 4, kind: output, shape index: {}]  }
   0x1   :  { %10 = vsyncpa [#allocation7], 0 }
   0x2   :  { %11 = vsyncpa [#allocation5], 0  ;;  %s4553_s15 = smov [#allocation6]   ;;  %s4459_s19 = scalar_lea.hbm %s5452_s1, 2048 }
   0x3   :  { %s29_s16 = sshll.u32 %s4553_s15, 4  ;;  %p4460_p0 = scmp.ne.s32.totalorder %s5452_s1, %s4459_s19  ;;  %s30_s16 = int_to_ptr.vmem [resolvable:$true] %s29_s16 }
   0x4   :  { %p4463_p1 = scmp.lt.u32.totalorder %s4459_s19, %s5452_s1 }
   0x6   :  { %p4465_p2 = pnand %p4463_p1, %p4460_p0 }
   0x8   :  { %4468 = shalt.err (!%p4465_p2)
}
   0x9   :  { %s4469_s24 = scalar_lea.vmem %s30_s16, 2048  ;;  %p4474_p4 = scmp.lt.s32.totalorder %s30_s16, %s30_s16 }
   0xa   :  { %p4470_p3 = scmp.ne.s32.totalorder %s30_s16, %s4469_s24  ;;  %p4475_p5 = scmp.lt.s32.totalorder %s4469_s24, %s4469_s24 }
   0xc   :  { %p4476_p6 = por %p4475_p5, %p4474_p4 }
   0xe   :  { %p4477_p7 = pnand %p4476_p6, %p4470_p3 }
  0x10   :  { %4480 = shalt.err (!%p4477_p7)
}
  0x11   :  { %s4554_s25 = smov 64   ;;  %s4555_s26 = smov 4  }
  0x12   :  { %35 = dma.hbm_to_vmem [thread:$0]  %s5452_s1, 2048, %s30_s16, [#allocation7], %s4554_s25, %s4554_s25, %s4555_s26  }
  0x13   :  { %s4556_s29 = smov [#allocation3]   ;;  %s4481_s7 = scalar_lea.hbm %s5451_s0, 4096 }
  0x14   :  { %s17_s30 = sshll.u32 %s4556_s29, 4  ;;  %p4482_p8 = scmp.ne.s32.totalorder %s5451_s0, %s4481_s7  ;;  %s18_s30 = int_to_ptr.vmem [resolvable:$true] %s17_s30 }
  0x15   :  { %p4485_p9 = scmp.lt.u32.totalorder %s4481_s7, %s5451_s0 }
  0x17   :  { %p4487_p10 = pnand %p4485_p9, %p4482_p8 }
  0x19   :  { %4490 = shalt.err (!%p4487_p10)
}
  0x1a   :  { %s4491_s12 = scalar_lea.vmem %s18_s30, 4096  ;;  %p4496_p12 = scmp.lt.s32.totalorder %s18_s30, %s18_s30 }
  0x1b   :  { %p4492_p11 = scmp.ne.s32.totalorder %s18_s30, %s4491_s12  ;;  %p4497_p13 = scmp.lt.s32.totalorder %s4491_s12, %s4491_s12 }
  0x1d   :  { %p4498_p0 = por %p4497_p13, %p4496_p12 }
  0x1f   :  { %p4499_p1 = pnand %p4498_p0, %p4492_p11 }
  0x21   :  { %4502 = shalt.err (!%p4499_p1)
}
  0x22   :  { %s4557_s1 = smov 128   ;;  %s4558_s13 = smov 8  }
  0x23   :  { %23 = dma.hbm_to_vmem [thread:$0]  %s5451_s0, 4096, %s18_s30, [#allocation4], %s4557_s1, %s4557_s1, %s4558_s13  }
  0x24   :  { %s4559_s16 = smov [#allocation8]   ;;  %s4503_s20 = scalar_lea.hbm %s5453_s2, 2048 }
  0x25   :  { %s41_s17 = sshll.u32 %s4559_s16, 4  ;;  %p4504_p2 = scmp.ne.s32.totalorder %s5453_s2, %s4503_s20  ;;  %s42_s17 = int_to_ptr.vmem [resolvable:$true] %s41_s17 }
  0x26   :  { %p4507_p3 = scmp.lt.u32.totalorder %s4503_s20, %s5453_s2 }
  0x28   :  { %p4509_p4 = pnand %p4507_p3, %p4504_p2 }
  0x2a   :  { %4512 = shalt.err (!%p4509_p4)
}
  0x2b   :  { %s4513_s27 = scalar_lea.vmem %s42_s17, 2048  ;;  %p4518_p6 = scmp.lt.s32.totalorder %s42_s17, %s42_s17 }
  0x2c   :  { %p4514_p5 = scmp.ne.s32.totalorder %s42_s17, %s4513_s27  ;;  %p4519_p7 = scmp.lt.s32.totalorder %s4513_s27, %s4513_s27 }
  0x2e   :  { %p4520_p8 = por %p4519_p7, %p4518_p6 }
  0x30   :  { %p4521_p9 = pnand %p4520_p8, %p4514_p5 }
  0x32   :  { %4524 = shalt.err (!%p4521_p9)
}
  0x33   :  { %47 = dma.hbm_to_vmem [thread:$0]  %s5453_s2, 2048, %s42_s17, [#allocation7], %s4557_s1, %s4557_s1, %s4558_s13  }
  0x34   :  { %4547 = dma.done.wait [#allocation4], 4096  }
  0x35   :  { %4548 = vsyncadd [#allocation4], 4294963200 }
  0x36   :  { %4549 = dma.done.wait [#allocation7], 4096  }
  0x37   :  { %4550 = vsyncadd [#allocation7], 4294963200  ;;  %v4395_v0 = vld [vmem:[#allocation6 + $0x40] sm:$0xff]   ;;  %v4397_v2 = vld [vmem:[#allocation6 + $0x48] sm:$0xff]  }
  0x38   :  { %v4396_v1 = vld [vmem:[#allocation6] sm:$0xff]   ;;  %3123 = vmatprep.subr.bf16.mxu0 %v4395_v0  ;;  %v4398_v3 = vld [vmem:[#allocation6 + $0x8] sm:$0xff]   ;;  %v4399_v4 = vld [vmem:[#allocation6 + $0x50] sm:$0xff]  }
  0x39   :  { %3124 = vmatpush3.bf16.msra.mxu0 %v4396_v1  ;;  %v4400_v5 = vld [vmem:[#allocation6 + $0x10] sm:$0xff]   ;;  %v4401_v6 = vld [vmem:[#allocation6 + $0x58] sm:$0xff]   ;;  %v4403_v8 = vld [vmem:[#allocation6 + $0x60] sm:$0xff]  }
  0x3a   :  { %3125 = vmatprep.subr.bf16.mxu0 %v4397_v2  ;;  %v4402_v7 = vld [vmem:[#allocation6 + $0x18] sm:$0xff]   ;;  %v4404_v9 = vld [vmem:[#allocation6 + $0x20] sm:$0xff]   ;;  %v4405_v10 = vld [vmem:[#allocation6 + $0x68] sm:$0xff]  }
  0x3b   :  { %v4413_v11 = vld [vmem:[#allocation3 + $0x4] ss:$8 sps:$4 sm:$0xff]   ;;  %v4407_v13 = vld [vmem:[#allocation6 + $0x70] sm:$0xff]   ;;  %v4409_v15 = vld [vmem:[#allocation6 + $0x78] sm:$0xff]  }
  0x3c   :  { %v4406_v12 = vld [vmem:[#allocation6 + $0x28] sm:$0xff]   ;;  %480 = vmatprep.mubr.bf16.mxu0 %v4413_v11  ;;  %v4408_v14 = vld [vmem:[#allocation6 + $0x30] sm:$0xff]   ;;  %v4410_v16 = vld [vmem:[#allocation6 + $0x38] sm:$0xff]  }
  0x3d   :  { %3126 = vmatpush3.bf16.msra.mxu0 %v4398_v3  ;;  %v4411_v17 = vld [vmem:[#allocation3] ss:$8 sps:$4 sm:$0xff]   ;;  %v4414_v18 = vld [vmem:[#allocation3 + $0x14] ss:$8 sps:$4 sm:$0xff]   ;;  %v4416_v19 = vld [vmem:[#allocation3 + $0x10] ss:$8 sps:$4 sm:$0xff]  }
  0x3e   :  { %3127 = vmatprep.subr.bf16.mxu0 %v4399_v4  ;;  %v4417_v20 = vld [vmem:[#allocation3 + $0x24] ss:$8 sps:$4 sm:$0xff]   ;;  %v710_v25 = vld [vmem:[#allocation8 + $0x10] sm:$0xff]  ;;  %v711_v26 = vld [vmem:[#allocation8 + $0x18] sm:$0xff] }
  0x3f   :  { %v708_v21 = vld [vmem:[#allocation8] sm:$0xff]  ;;  %v709_v22 = vld [vmem:[#allocation8 + $0x8] sm:$0xff]  ;;  %v738_v28 = vand.u32 4294901760, %v710_v25  ;;  %v741_v29 = vand.u32 4294901760, %v711_v26  ;;  %v714_v32 = vld [vmem:[#allocation8 + $0x30] sm:$0xff] }
  0x40   :  { %v732_v23 = vand.u32 4294901760, %v708_v21  ;;  %v735_v24 = vand.u32 4294901760, %v709_v22  ;;  %v712_v27 = vld [vmem:[#allocation8 + $0x20] sm:$0xff]  ;;  %v713_v30 = vld [vmem:[#allocation8 + $0x28] sm:$0xff]  ;;  %v715_v37 = vld [vmem:[#allocation8 + $0x38] sm:$0xff]  ;;  %v750_v44 = vand.u32 4294901760, %v714_v32 }
  0x41   :  { %3128 = vmatpush3.bf16.msra.mxu0 %v4400_v5  ;;  %v744_v31 = vand.u32 4294901760, %v712_v27  ;;  %v747_v36 = vand.u32 4294901760, %v713_v30  ;;  %v4631_v38 = vpack.c.bf16 %v741_v29, %v738_v28  ;;  %v4633_v39 = vsub.f32 %v710_v25, %v738_v28  ;;  %v716_v45 = vld [vmem:[#allocation8 + $0x40] sm:$0xff]  ;;  %v717_v48 = vld [vmem:[#allocation8 + $0x48] sm:$0xff]  ;;  %v718_v56 = vld [vmem:[#allocation8 + $0x50] sm:$0xff] }
  0x42   :  { %3129 = vmatprep.subr.bf16.mxu0 %v4401_v6  ;;  %v4625_v33 = vpack.c.bf16 %v735_v24, %v732_v23  ;;  %v4627_v34 = vsub.f32 %v708_v21, %v732_v23  ;;  %v4629_v35 = vsub.f32 %v709_v22, %v735_v24  ;;  %v4635_v40 = vsub.f32 %v711_v26, %v741_v29  ;;  %v4419_v51 = vld [vmem:[#allocation3 + $0x20] ss:$8 sps:$4 sm:$0xff]   ;;  %v4420_v57 = vld [vmem:[#allocation3 + $0x34] ss:$8 sps:$4 sm:$0xff]   ;;  %v4422_v2 = vld [vmem:[#allocation3 + $0x30] ss:$8 sps:$4 sm:$0xff]  }
  0x43   :  { %5530 = vst [vmem:[#allocation13_spill] sm:$0xff] %v4631_v38  ;;  %v4640_v42 = vsub.f32 %v712_v27, %v744_v31  ;;  %v4642_v43 = vsub.f32 %v713_v30, %v747_v36  ;;  %v753_v47 = vand.u32 4294901760, %v715_v37  ;;  %v4647_v49 = vpack.c.bf16 %v747_v36, %v744_v31  ;;  %v719_v58 = vld [vmem:[#allocation8 + $0x58] sm:$0xff]  ;;  %v4423_v6 = vld [vmem:[#allocation3 + $0x44] ss:$8 sps:$4 sm:$0xff]   ;;  %v722_v29 = vld [vmem:[#allocation8 + $0x70] sm:$0xff] }
  0x44   :  { %v4067_v41 = vpack.c.bf16 %v4629_v35, %v4627_v34  ;;  %v4071_v46 = vpack.c.bf16 %v4635_v40, %v4633_v39  ;;  %v756_v50 = vand.u32 4294901760, %v716_v45  ;;  %v4652_v53 = vsub.f32 %v714_v32, %v750_v44  ;;  %v4428_v11 = vld [vmem:[#allocation3 + $0x50] ss:$8 sps:$4 sm:$0xff]   ;;  %v4443_v21 = vld [vmem:[#allocation3 + $0xa0] ss:$8 sps:$4 sm:$0xff]  }
  0x45   :  { %3130 = vmatpush3.bf16.msra.mxu0 %v4402_v7  ;;  %5531 = vst [vmem:[#allocation14_spill] sm:$0xff] %v4647_v49  ;;  %v4075_v52 = vpack.c.bf16 %v4642_v43, %v4640_v42  ;;  %v4654_v54 = vsub.f32 %v715_v37, %v753_v47  ;;  %v759_v55 = vand.u32 4294901760, %v717_v48  ;;  %v4657_v59 = vpack.c.bf16 %v753_v47, %v750_v44  ;;  %v4444_v22 = vld [vmem:[#allocation3 + $0xb4] ss:$8 sps:$4 sm:$0xff]   ;;  %v720_v23 = vld [vmem:[#allocation8 + $0x60] sm:$0xff]  ;;  %v721_v24 = vld [vmem:[#allocation8 + $0x68] sm:$0xff] }
  0x46   :  { %3131 = vmatprep.subr.bf16.mxu0 %v4403_v8  ;;  %4068 = vmatprep.subr.bf16.mxu1 %v4067_v41  ;;  %v762_v60 = vand.u32 4294901760, %v718_v56  ;;  %v4662_v62 = vsub.f32 %v716_v45, %v756_v50  ;;  %v765_v0 = vand.u32 4294901760, %v719_v58  ;;  %v768_v25 = vand.u32 4294901760, %v720_v23  ;;  %v723_v30 = vld [vmem:[#allocation8 + $0x78] sm:$0xff] }
  0x47   :  { %4070 = vmatpush3.bf16.msra.mxu1 %v4067_v41  ;;  %5532 = vst [vmem:[#allocation15_spill] sm:$0xff] %v4657_v59  ;;  %v4079_v61 = vpack.c.bf16 %v4654_v54, %v4652_v53  ;;  %v4664_v63 = vsub.f32 %v717_v48, %v759_v55  ;;  %v4667_v1 = vpack.c.bf16 %v759_v55, %v756_v50  ;;  %v771_v26 = vand.u32 4294901760, %v721_v24  ;;  %v4446_v37 = vld [vmem:[#allocation3 + $0xb0] ss:$8 sps:$4 sm:$0xff]   ;;  %v4447_v41 = vld [vmem:[#allocation3 + $0xc4] ss:$8 sps:$4 sm:$0xff]  }
  0x48   :  { %4072 = vmatprep.subr.bf16.mxu1 %v4071_v46  ;;  %v4672_v4 = vsub.f32 %v718_v56, %v762_v60  ;;  %v4674_v5 = vsub.f32 %v719_v58, %v765_v0  ;;  %v4677_v7 = vpack.c.bf16 %v765_v0, %v762_v60  ;;  %v4685_v27 = vsub.f32 %v720_v23, %v768_v25  ;;  %v4449_v48 = vld [vmem:[#allocation3 + $0xc0] ss:$8 sps:$4 sm:$0xff]   ;;  %v4450_v50 = vld [vmem:[#allocation3 + $0xd4] ss:$8 sps:$4 sm:$0xff]   ;;  %v4453_v55 = vld [vmem:[#allocation3 + $0xe4] ss:$8 sps:$4 sm:$0xff]  }
  0x49   :  { %3132 = vmatpush3.bf16.msra.mxu0 %v4404_v9  ;;  %5533 = vst [vmem:[#allocation16_spill] sm:$0xff] %v4667_v1  ;;  %v4083_v3 = vpack.c.bf16 %v4664_v63, %v4662_v62  ;;  %v4425_v9 = vld [vmem:[#allocation3 + $0x40] ss:$8 sps:$4 sm:$0xff]   ;;  %v4687_v28 = vsub.f32 %v721_v24, %v771_v26  ;;  %v774_v32 = vand.u32 4294901760, %v722_v29  ;;  %v777_v36 = vand.u32 4294901760, %v723_v30 }
  0x4a   :  { %3133 = vmatprep.subr.bf16.mxu0 %v4405_v10  ;;  %5534 = vst [vmem:[#allocation17_spill] sm:$0xff] %v4677_v7  ;;  %v4087_v8 = vpack.c.bf16 %v4674_v5, %v4672_v4  ;;  %v4426_v10 = vld [vmem:[#allocation3 + $0x54] ss:$8 sps:$4 sm:$0xff]   ;;  %v4697_v47 = vpack.c.bf16 %v771_v26, %v768_v25  ;;  %v4455_v56 = vld [vmem:[#allocation3 + $0xe0] ss:$8 sps:$4 sm:$0xff]   ;;  %v1135_v60 = vand.u32 4294901760, %v4627_v34 }
  0x4b   :  { %4074 = vmatpush3.bf16.msra.mxu1 %v4071_v46  ;;  %v4091_v31 = vpack.c.bf16 %v4687_v28, %v4685_v27  ;;  %v4691_v44 = vsub.f32 %v722_v29, %v774_v32  ;;  %v4693_v45 = vsub.f32 %v723_v30, %v777_v36  ;;  %v4458_v58 = vld [vmem:[#allocation3 + $0xf0] ss:$8 sps:$4 sm:$0xff]  }
  0x4c   :  { %4076 = vmatprep.subr.bf16.mxu1 %v4075_v52  ;;  %5535 = vst [vmem:[#allocation18_spill] sm:$0xff] %v4697_v47  ;;  %v1136_v0 = vsub.f32 %v4627_v34, %v1135_v60 }
  0x4d   :  { %3134 = vmatpush3.bf16.msra.mxu0 %v4406_v12  ;;  %v4429_v12 = vld [vmem:[#allocation3 + $0x64] ss:$8 sps:$4 sm:$0xff]   ;;  %v4095_v46 = vpack.c.bf16 %v4693_v45, %v4691_v44 }
  0x4e   :  { %3135 = vmatprep.subr.bf16.mxu0 %v4407_v13  ;;  %v4431_v13 = vld [vmem:[#allocation3 + $0x60] ss:$8 sps:$4 sm:$0xff]  }
  0x4f   :  { %4078 = vmatpush3.bf16.msra.mxu1 %v4075_v52  ;;  %v4452_v52 = vld [vmem:[#allocation3 + $0xd0] ss:$8 sps:$4 sm:$0xff]  }
  0x50   :  { %4080 = vmatprep.subr.bf16.mxu1 %v4079_v61 }
  0x51   :  { %3136 = vmatpush3.bf16.msra.mxu0 %v4408_v14  ;;  %v4432_v14 = vld [vmem:[#allocation3 + $0x74] ss:$8 sps:$4 sm:$0xff]  }
  0x52   :  { %3137 = vmatprep.subr.bf16.mxu0 %v4409_v15  ;;  %v4434_v15 = vld [vmem:[#allocation3 + $0x70] ss:$8 sps:$4 sm:$0xff]  }
  0x53   :  { %4082 = vmatpush3.bf16.msra.mxu1 %v4079_v61  ;;  %v1142_v61 = vand.u32 4294901760, %v4629_v35 }
  0x54   :  { %4084 = vmatprep.subr.bf16.mxu1 %v4083_v3 }
  0x55   :  { %3138 = vmatpush3.bf16.msra.mxu0 %v4410_v16  ;;  %v4435_v16 = vld [vmem:[#allocation3 + $0x84] ss:$8 sps:$4 sm:$0xff]  }
  0x56   :  { %4004 = vmatprep.subr.bf16.mxu0 %v4625_v33 }
  0x57   :  { %4086 = vmatpush3.bf16.msra.mxu1 %v4083_v3  ;;  %v1137_v3 = vand.u32 4294901760, %v1136_v0 }
  0x58   :  { %481 = vmatmul.mubr.bf16.vlgmr.msra.gmra.mrb[0].mxu0 %v4411_v17  ;;  %4088 = vmatprep.subr.bf16.mxu1 %v4087_v8  ;;  %v4437_v17 = vld [vmem:[#allocation3 + $0x80] ss:$8 sps:$4 sm:$0xff]  }
  0x59   :  { %488 = vmatprep.mubr.bf16.mxu0 %v4414_v18  ;;  %4006 = vmatpush3.bf16.msra.mxu0 %v4625_v33  ;;  %v4438_v18 = vld [vmem:[#allocation3 + $0x94] ss:$8 sps:$4 sm:$0xff]  }
  0x5a   :  { %4008 = vmatprep.subr.bf16.mxu0 %v4631_v38 }
  0x5b   :  { %4090 = vmatpush3.bf16.msra.mxu1 %v4087_v8 }
  0x5c   :  { %4092 = vmatprep.subr.bf16.mxu1 %v4091_v31 }
  0x5d   :  { %4010 = vmatpush3.bf16.msra.mxu0 %v4631_v38 }
  0x5e   :  { %4012 = vmatprep.subr.bf16.mxu0 %v4647_v49 }
  0x5f   :  { %4094 = vmatpush3.bf16.msra.mxu1 %v4091_v31  ;;  %v1177_v31 = vand.u32 4294901760, %v4652_v53 }
  0x60   :  { %489 = vmatmul.mubr.bf16.gmra.mrb[4].mxu0 %v4416_v19  ;;  %v4440_v19 = vld [vmem:[#allocation3 + $0x90] ss:$8 sps:$4 sm:$0xff]   ;;  %4096 = vmatprep.subr.bf16.mxu1 %v4095_v46 }
  0x61   :  { %496 = vmatprep.mubr.bf16.mxu0 %v4417_v20  ;;  %4014 = vmatpush3.bf16.msra.mxu0 %v4647_v49  ;;  %v4441_v20 = vld [vmem:[#allocation3 + $0xa4] ss:$8 sps:$4 sm:$0xff]   ;;  %v1178_v0 = vsub.f32 %v4652_v53, %v1177_v31 }
  0x62   :  { %4016 = vmatprep.subr.bf16.mxu0 %v4657_v59 }
  0x63   :  { %4098 = vmatpush3.bf16.msra.mxu1 %v4095_v46  ;;  %v1184_v46 = vand.u32 4294901760, %v4654_v54 }
  0x64   :  { %4100 = vmatprep.subr.bf16.mxu1 %v4625_v33 }
  0x65   :  { %4018 = vmatpush3.bf16.msra.mxu0 %v4657_v59 }
  0x66   :  { %4020 = vmatprep.subr.bf16.mxu0 %v4667_v1 }
  0x68   :  { %497 = vmatmul.mubr.bf16.gmra.mrb[8].mxu0 %v4419_v51  ;;  %v4702_v51 = vpack.c.bf16 %v777_v36, %v774_v32 }
  0x69   :  { %504 = vmatprep.mubr.bf16.mxu0 %v4420_v57  ;;  %4022 = vmatpush3.bf16.msra.mxu0 %v4667_v1  ;;  %v4456_v57 = vld [vmem:[#allocation3 + $0xf4] ss:$8 sps:$4 sm:$0xff]  }
  0x6a   :  { %4024 = vmatprep.subr.bf16.mxu0 %v4677_v7  ;;  %5536 = vst [vmem:[#allocation19_spill] sm:$0xff] %v4702_v51 }
  0x6d   :  { %4026 = vmatpush3.bf16.msra.mxu0 %v4677_v7 }
  0x6e   :  { %4028 = vmatprep.subr.bf16.mxu0 %v4697_v47 }
  0x70   :  { %505 = vmatmul.mubr.bf16.gmra.mrb[12].mxu0 %v4422_v2  ;;  %v1143_v2 = vsub.f32 %v4629_v35, %v1142_v61  ;;  %v1163_v35 = vand.u32 4294901760, %v4640_v42 }
  0x71   :  { %512 = vmatprep.mubr.bf16.mxu0 %v4423_v6  ;;  %4030 = vmatpush3.bf16.msra.mxu0 %v4697_v47 }
  0x72   :  { %4032 = vmatprep.subr.bf16.mxu0 %v4702_v51  ;;  %v1144_v6 = vand.u32 4294901760, %v1143_v2  ;;  %v1198_v2 = vand.u32 4294901760, %v4664_v63 }
  0x74   :  { %v4710_v8 = vpack.c.bf16 %v1144_v6, %v1137_v3 }
  0x75   :  { %4034 = vmatpush3.bf16.msra.mxu0 %v4702_v51 }
  0x76   :  { %4036 = vmatprep.subr.bf16.mxu0 %v4710_v8 }
  0x78   :  { %513 = vmatmul.mubr.bf16.gmra.mrb[16].mxu0 %v4425_v9  ;;  %v1149_v9 = vand.u32 4294901760, %v4633_v39 }
  0x79   :  { %520 = vmatprep.mubr.bf16.mxu0 %v4426_v10  ;;  %v1156_v10 = vand.u32 4294901760, %v4635_v40 }
  0x7b   :  { %v1157_v34 = vsub.f32 %v4635_v40, %v1156_v10  ;;  %v4758_v3 = vpack.c.bf16 %v1156_v10, %v1149_v9  ;;  %v1212_v10 = vand.u32 4294901760, %v4674_v5 }
  0x7d   :  { %v1158_v24 = vand.u32 4294901760, %v1157_v34 }
  0x80   :  { %521 = vmatmul.mubr.bf16.gmra.mrb[20].mxu0 %v4428_v11 }
  0x81   :  { %528 = vmatprep.mubr.bf16.mxu0 %v4429_v12 }
  0x88   :  { %529 = vmatmul.mubr.bf16.gmra.mrb[24].mxu0 %v4431_v13 }
  0x89   :  { %536 = vmatprep.mubr.bf16.mxu0 %v4432_v14 }
  0x90   :  { %537 = vmatmul.mubr.bf16.gmra.mrb[28].mxu0 %v4434_v15 }
  0x91   :  { %544 = vmatprep.mubr.bf16.mxu0 %v4435_v16  ;;  %v1150_v16 = vsub.f32 %v4633_v39, %v1149_v9  ;;  %v1164_v39 = vsub.f32 %v4640_v42, %v1163_v35  ;;  %v1205_v9 = vand.u32 4294901760, %v4672_v4 }
  0x93   :  { %v1151_v23 = vand.u32 4294901760, %v1150_v16 }
  0x98   :  { %545 = vmatmul.mubr.bf16.gmra.mrb[32].mxu0 %v4437_v17  ;;  %v4718_v17 = vpack.c.bf16 %v1142_v61, %v1135_v60 }
  0x99   :  { %552 = vmatprep.mubr.bf16.mxu0 %v4438_v18 }
  0xa0   :  { %553 = vmatmul.mubr.bf16.gmra.mrb[36].mxu0 %v4440_v19 }
  0xa1   :  { %560 = vmatprep.mubr.bf16.mxu0 %v4441_v20  ;;  %v1170_v20 = vand.u32 4294901760, %v4642_v43 }
  0xa3   :  { %v1171_v30 = vsub.f32 %v4642_v43, %v1170_v20 }
  0xa5   :  { %v1172_v61 = vand.u32 4294901760, %v1171_v30 }
  0xa8   :  { %561 = vmatmul.mubr.bf16.gmra.mrb[40].mxu0 %v4443_v21 }
  0xa9   :  { %568 = vmatprep.mubr.bf16.mxu0 %v4444_v22 }
  0xb0   :  { %569 = vmatmul.mubr.bf16.gmra.mrb[44].mxu0 %v4446_v37 }
  0xb1   :  { %576 = vmatprep.mubr.bf16.mxu0 %v4447_v41 }
  0xb8   :  { %577 = vmatmul.mubr.bf16.gmra.mrb[48].mxu0 %v4449_v48 }
  0xb9   :  { %584 = vmatprep.mubr.bf16.mxu0 %v4450_v50  ;;  %v4039_v50 = vpack.c.bf16 %v1158_v24, %v1151_v23  ;;  %v1179_v24 = vand.u32 4294901760, %v1178_v0 }
  0xc0   :  { %585 = vmatmul.mubr.bf16.gmra.mrb[52].mxu0 %v4452_v52  ;;  %v1165_v52 = vand.u32 4294901760, %v1164_v39  ;;  %v1199_v39 = vsub.f32 %v4664_v63, %v1198_v2 }
  0xc1   :  { %592 = vmatprep.mubr.bf16.mxu0 %v4453_v55  ;;  %v1191_v55 = vand.u32 4294901760, %v4662_v62 }
  0xc2   :  { %v4043_v23 = vpack.c.bf16 %v1172_v61, %v1165_v52  ;;  %v1213_v52 = vsub.f32 %v4674_v5, %v1212_v10  ;;  %v1200_v0 = vand.u32 4294901760, %v1199_v39 }
  0xc8   :  { %593 = vmatmul.mubr.bf16.gmra.mrb[56].mxu0 %v4455_v56 }
  0xc9   :  { %600 = vmatprep.mubr.bf16.mxu0 %v4456_v57 }
  0xd0   :  { %601 = vmatmul.mubr.bf16.gmra.mrb[60].mxu0 %v4458_v58 }
 0x12b   :  { %v3139_v11 = vpop.f32.mrb[0].mxu0 }
 0x12c   :  { %v3140_v12 = vpop.f32.mrb[1].mxu0 }
 0x12d   :  { %v3141_v13 = vadd.f32 %v3140_v12, %v3139_v11  ;;  %v3142_v14 = vpop.f32.mrb[2].mxu0 }
 0x12e   :  { %v3143_v15 = vpop.f32.mrb[3].mxu0 }
 0x12f   :  { %v4720_v18 = vand.u32 4294901760, %v3141_v13  ;;  %v3144_v19 = vadd.f32 %v3143_v15, %v3142_v14  ;;  %v1192_v14 = vsub.f32 %v4662_v62, %v1191_v55 }
 0x131   :  { %v4724_v21 = vsub.f32 %v3141_v13, %v4720_v18  ;;  %v4726_v22 = vand.u32 4294901760, %v3144_v19  ;;  %v1185_v13 = vsub.f32 %v4654_v54, %v1184_v46 }
 0x133   :  { %v4732_v40 = vsub.f32 %v3144_v19, %v4726_v22  ;;  %v3145_v25 = vpop.f32.mrb[4].mxu0  ;;  %3715 = vmatprep.mubr.f32.mxu1 %v4724_v21  ;;  %v5471_v26 = vand.u32 4294901760, %v4724_v21 }
 0x134   :  { %v3146_v29 = vpop.f32.mrb[5].mxu0 }
 0x135   :  { %v5469_v32 = vand.u32 4294901760, %v4732_v40  ;;  %v3147_v36 = vadd.f32 %v3146_v29, %v3145_v25  ;;  %v3148_v37 = vpop.f32.mrb[6].mxu0  ;;  %3716 = vmatmul.mubr.f32.vlgmr.msra.gmra.mrb[0].mxu1 %v4732_v40  ;;  %v815_v41 = vsub.f32 %v4724_v21, %v5471_v26 }
 0x136   :  { %v3149_v48 = vpop.f32.mrb[7].mxu0  ;;  %4102 = vmatpush3.bf16.msra.mxu1 %v4625_v33 }
 0x137   :  { %v825_v56 = vsub.f32 %v4732_v40, %v5469_v32  ;;  %v4751_v57 = vand.u32 4294901760, %v3147_v36  ;;  %v3150_v58 = vadd.f32 %v3149_v48, %v3148_v37  ;;  %v816_v60 = vand.u32 4294901760, %v815_v41  ;;  %4104 = vmatprep.subr.bf16.mxu1 %v4631_v38 }
 0x138   :  { %v1186_v37 = vand.u32 4294901760, %v1185_v13  ;;  %v1206_v48 = vsub.f32 %v4672_v4, %v1205_v9  ;;  %v1226_v13 = vand.u32 4294901760, %v4687_v28 }
 0x139   :  { %v826_v6 = vand.u32 4294901760, %v825_v56  ;;  %v4761_v11 = vsub.f32 %v3147_v36, %v4751_v57  ;;  %v4763_v12 = vand.u32 4294901760, %v3150_v58  ;;  %3555 = vmatprep.mubr.f32.mxu0 %v816_v60 }
 0x13a   :  { %4106 = vmatpush3.bf16.msra.mxu1 %v4631_v38  ;;  %v1207_v39 = vand.u32 4294901760, %v1206_v48 }
 0x13b   :  { %v4775_v15 = vsub.f32 %v3150_v58, %v4763_v12  ;;  %v3151_v16 = vpop.f32.mrb[8].mxu0  ;;  %3556 = vmatmul.mubr.f32.vlgmr.msra.gmra.mrb[64].mxu0 %v826_v6  ;;  %3718 = vmatprep.mubr.f32.mxu1 %v4761_v11  ;;  %v5458_v34 = vand.u32 4294901760, %v4761_v11  ;;  %v1219_v6 = vand.u32 4294901760, %v4685_v27 }
 0x13c   :  { %v3152_v19 = vpop.f32.mrb[9].mxu0  ;;  %4108 = vmatprep.subr.bf16.mxu1 %v4647_v49  ;;  %4038 = vmatpush3.bf16.msra.mxu0 %v4710_v8  ;;  %v1193_v8 = vand.u32 4294901760, %v1192_v14  ;;  %v4808_v14 = vpack.c.bf16 %v1170_v20, %v1163_v35 }
 0x13d   :  { %v3153_v25 = vadd.f32 %v3152_v19, %v3151_v16  ;;  %v3154_v29 = vpop.f32.mrb[10].mxu0  ;;  %3719 = vmatmul.mubr.f32.gmra.mrb[2].mxu1 %v4775_v15  ;;  %v835_v30 = vsub.f32 %v4761_v11, %v5458_v34  ;;  %v5457_v36 = vand.u32 4294901760, %v4775_v15  ;;  %4040 = vmatprep.subr.bf16.mxu0 %v4039_v50 }
 0x13e   :  { %v3155_v41 = vpop.f32.mrb[11].mxu0  ;;  %4110 = vmatpush3.bf16.msra.mxu1 %v4647_v49  ;;  %v4051_v20 = vpack.c.bf16 %v1200_v0, %v1193_v8  ;;  %v1240_v8 = vand.u32 4294901760, %v4693_v45 }
 0x13f   :  { %v4796_v56 = vand.u32 4294901760, %v3153_v25  ;;  %v3156_v58 = vadd.f32 %v3155_v41, %v3154_v29  ;;  %v836_v60 = vand.u32 4294901760, %v835_v30  ;;  %v845_v61 = vsub.f32 %v4775_v15, %v5457_v36  ;;  %4112 = vmatprep.subr.bf16.mxu1 %v4657_v59 }
 0x140   :  { %4042 = vmatpush3.bf16.msra.mxu0 %v4039_v50  ;;  %v4047_v50 = vpack.c.bf16 %v1186_v37, %v1179_v24  ;;  %v1214_v30 = vand.u32 4294901760, %v1213_v52  ;;  %v1220_v24 = vsub.f32 %v4685_v27, %v1219_v6  ;;  %v1233_v37 = vand.u32 4294901760, %v4691_v44 }
 0x141   :  { %v4811_v16 = vsub.f32 %v3153_v25, %v4796_v56  ;;  %v4813_v19 = vand.u32 4294901760, %v3156_v58  ;;  %3558 = vmatprep.mubr.f32.mxu0 %v836_v60  ;;  %v846_v29 = vand.u32 4294901760, %v845_v61  ;;  %4044 = vmatprep.subr.bf16.mxu0 %v4043_v23  ;;  %v1227_v25 = vsub.f32 %v4687_v28, %v1226_v13 }
 0x142   :  { %4114 = vmatpush3.bf16.msra.mxu1 %v4657_v59  ;;  %v4055_v61 = vpack.c.bf16 %v1214_v30, %v1207_v39  ;;  %v1234_v34 = vsub.f32 %v4691_v44, %v1233_v37  ;;  %v4849_v39 = vpack.c.bf16 %v1184_v46, %v1177_v31 }
 0x143   :  { %v4817_v41 = vsub.f32 %v3156_v58, %v4813_v19  ;;  %v3157_v42 = vpop.f32.mrb[12].mxu0  ;;  %3559 = vmatmul.mubr.f32.gmra.mrb[66].mxu0 %v846_v29  ;;  %3721 = vmatprep.mubr.f32.mxu1 %v4811_v16  ;;  %v5456_v43 = vand.u32 4294901760, %v4811_v16  ;;  %v1228_v36 = vand.u32 4294901760, %v1227_v25 }
 0x144   :  { %v3158_v35 = vpop.f32.mrb[13].mxu0  ;;  %4116 = vmatprep.subr.bf16.mxu1 %v4667_v1  ;;  %4046 = vmatpush3.bf16.msra.mxu0 %v4043_v23  ;;  %v1235_v25 = vand.u32 4294901760, %v1234_v34 }
 0x145   :  { %v3159_v48 = vadd.f32 %v3158_v35, %v3157_v42  ;;  %v3160_v52 = vpop.f32.mrb[14].mxu0  ;;  %3722 = vmatmul.mubr.f32.gmra.mrb[4].mxu1 %v4817_v41  ;;  %v855_v58 = vsub.f32 %v4811_v16, %v5456_v43  ;;  %v5459_v23 = vand.u32 4294901760, %v4817_v41  ;;  %4048 = vmatprep.subr.bf16.mxu0 %v4047_v50  ;;  %v1221_v43 = vand.u32 4294901760, %v1220_v24 }
 0x146   :  { %v3161_v60 = vpop.f32.mrb[15].mxu0  ;;  %4118 = vmatpush3.bf16.msra.mxu1 %v4667_v1 }
 0x147   :  { %v4836_v0 = vand.u32 4294901760, %v3159_v48  ;;  %v3162_v29 = vadd.f32 %v3161_v60, %v3160_v52  ;;  %v856_v42 = vand.u32 4294901760, %v855_v58  ;;  %v865_v35 = vsub.f32 %v4817_v41, %v5459_v23  ;;  %4120 = vmatprep.subr.bf16.mxu1 %v4677_v7 }
 0x148   :  { %4050 = vmatpush3.bf16.msra.mxu0 %v4047_v50  ;;  %v1241_v50 = vsub.f32 %v4693_v45, %v1240_v8  ;;  %v4059_v24 = vpack.c.bf16 %v1228_v36, %v1221_v43  ;;  %v4882_v43 = vpack.c.bf16 %v1198_v2, %v1191_v55 }
 0x149   :  { %v4852_v30 = vsub.f32 %v3159_v48, %v4836_v0  ;;  %v4854_v52 = vand.u32 4294901760, %v3162_v29  ;;  %3561 = vmatprep.mubr.f32.mxu0 %v856_v42  ;;  %v866_v58 = vand.u32 4294901760, %v865_v35  ;;  %4052 = vmatprep.subr.bf16.mxu0 %v4051_v20 }
 0x14a   :  { %4122 = vmatpush3.bf16.msra.mxu1 %v4677_v7  ;;  %v1242_v35 = vand.u32 4294901760, %v1241_v50 }
 0x14b   :  { %v4861_v53 = vsub.f32 %v3162_v29, %v4854_v52  ;;  %v3163_v54 = vpop.f32.mrb[16].mxu0  ;;  %3562 = vmatmul.mubr.f32.gmra.mrb[68].mxu0 %v866_v58  ;;  %3724 = vmatprep.mubr.f32.mxu1 %v4852_v30  ;;  %v5468_v31 = vand.u32 4294901760, %v4852_v30 }
 0x14c   :  { %v3164_v46 = vpop.f32.mrb[17].mxu0  ;;  %4124 = vmatprep.subr.bf16.mxu1 %v4697_v47  ;;  %4054 = vmatpush3.bf16.msra.mxu0 %v4051_v20 }
 0x14d   :  { %v3165_v48 = vadd.f32 %v3164_v46, %v3163_v54  ;;  %v3166_v60 = vpop.f32.mrb[18].mxu0  ;;  %3725 = vmatmul.mubr.f32.gmra.mrb[6].mxu1 %v4861_v53  ;;  %v875_v29 = vsub.f32 %v4852_v30, %v5468_v31  ;;  %v5466_v42 = vand.u32 4294901760, %v4861_v53  ;;  %4056 = vmatprep.subr.bf16.mxu0 %v4055_v61 }
 0x14e   :  { %v3167_v58 = vpop.f32.mrb[19].mxu0  ;;  %4126 = vmatpush3.bf16.msra.mxu1 %v4697_v47 }
 0x14f   :  { %v4872_v23 = vand.u32 4294901760, %v3165_v48  ;;  %v3168_v20 = vadd.f32 %v3167_v58, %v3166_v60  ;;  %v876_v36 = vand.u32 4294901760, %v875_v29  ;;  %v885_v34 = vsub.f32 %v4861_v53, %v5466_v42  ;;  %4128 = vmatprep.subr.bf16.mxu1 %v4702_v51 }
 0x150   :  { %4058 = vmatpush3.bf16.msra.mxu0 %v4055_v61  ;;  %v4063_v60 = vpack.c.bf16 %v1242_v35, %v1235_v25 }
 0x151   :  { %v4885_v50 = vsub.f32 %v3165_v48, %v4872_v23  ;;  %v4887_v54 = vand.u32 4294901760, %v3168_v20  ;;  %3564 = vmatprep.mubr.f32.mxu0 %v876_v36  ;;  %v886_v46 = vand.u32 4294901760, %v885_v34  ;;  %4060 = vmatprep.subr.bf16.mxu0 %v4059_v24  ;;  %v4910_v34 = vpack.c.bf16 %v1212_v10, %v1205_v9 }
 0x152   :  { %4130 = vmatpush3.bf16.msra.mxu1 %v4702_v51 }
 0x153   :  { %v4891_v29 = vsub.f32 %v3168_v20, %v4887_v54  ;;  %v3169_v61 = vpop.f32.mrb[20].mxu0  ;;  %3565 = vmatmul.mubr.f32.gmra.mrb[70].mxu0 %v886_v46  ;;  %3727 = vmatprep.mubr.f32.mxu1 %v4885_v50  ;;  %v5464_v62 = vand.u32 4294901760, %v4885_v50 }
 0x154   :  { %v3170_v63 = vpop.f32.mrb[21].mxu0  ;;  %4062 = vmatpush3.bf16.msra.mxu0 %v4059_v24  ;;  %4132 = vmatprep.subr.bf16.mxu1 %v4718_v17 }
 0x155   :  { %v3171_v55 = vadd.f32 %v3170_v63, %v3169_v61  ;;  %v3172_v2 = vpop.f32.mrb[22].mxu0  ;;  %3728 = vmatmul.mubr.f32.gmra.mrb[8].mxu1 %v4891_v29  ;;  %v895_v25 = vsub.f32 %v4885_v50, %v5464_v62  ;;  %v5461_v48 = vand.u32 4294901760, %v4891_v29  ;;  %4064 = vmatprep.subr.bf16.mxu0 %v4063_v60 }
 0x156   :  { %v3173_v35 = vpop.f32.mrb[23].mxu0 }
 0x157   :  { %v4901_v58 = vand.u32 4294901760, %v3171_v55  ;;  %v3174_v20 = vadd.f32 %v3173_v35, %v3172_v2  ;;  %v896_v36 = vand.u32 4294901760, %v895_v25  ;;  %v905_v24 = vsub.f32 %v4891_v29, %v5461_v48 }
 0x158   :  { %4066 = vmatpush3.bf16.msra.mxu0 %v4063_v60 }
 0x159   :  { %v4913_v46 = vsub.f32 %v3171_v55, %v4901_v58  ;;  %v4915_v61 = vand.u32 4294901760, %v3174_v20  ;;  %3567 = vmatprep.mubr.f32.mxu0 %v896_v36  ;;  %v906_v63 = vand.u32 4294901760, %v905_v24 }
 0x15b   :  { %v4918_v2 = vsub.f32 %v3174_v20, %v4915_v61  ;;  %v3175_v25 = vpop.f32.mrb[24].mxu0  ;;  %3568 = vmatmul.mubr.f32.gmra.mrb[72].mxu0 %v906_v63  ;;  %3730 = vmatprep.mubr.f32.mxu1 %v4913_v46  ;;  %v5460_v4 = vand.u32 4294901760, %v4913_v46 }
 0x15c   :  { %v3176_v60 = vpop.f32.mrb[25].mxu0 }
 0x15d   :  { %v3177_v5 = vadd.f32 %v3176_v60, %v3175_v25  ;;  %v3178_v9 = vpop.f32.mrb[26].mxu0  ;;  %3731 = vmatmul.mubr.f32.gmra.mrb[10].mxu1 %v4918_v2  ;;  %v915_v10 = vsub.f32 %v4913_v46, %v5460_v4  ;;  %v5462_v55 = vand.u32 4294901760, %v4918_v2  ;;  %v4936_v25 = vpack.c.bf16 %v1226_v13, %v1219_v6 }
 0x15e   :  { %v3179_v35 = vpop.f32.mrb[27].mxu0 }
 0x15f   :  { %v4927_v20 = vand.u32 4294901760, %v3177_v5  ;;  %v3180_v36 = vadd.f32 %v3179_v35, %v3178_v9  ;;  %v916_v24 = vand.u32 4294901760, %v915_v10  ;;  %v925_v63 = vsub.f32 %v4918_v2, %v5462_v55 }
 0x161   :  { %v4939_v60 = vsub.f32 %v3177_v5, %v4927_v20  ;;  %v4941_v4 = vand.u32 4294901760, %v3180_v36  ;;  %3570 = vmatprep.mubr.f32.mxu0 %v916_v24  ;;  %v926_v48 = vand.u32 4294901760, %v925_v63 }
 0x163   :  { %v4944_v9 = vsub.f32 %v3180_v36, %v4941_v4  ;;  %v3181_v10 = vpop.f32.mrb[28].mxu0  ;;  %3571 = vmatmul.mubr.f32.gmra.mrb[74].mxu0 %v926_v48  ;;  %3733 = vmatprep.mubr.f32.mxu1 %v4939_v60  ;;  %v5463_v27 = vand.u32 4294901760, %v4939_v60 }
 0x164   :  { %v3182_v35 = vpop.f32.mrb[29].mxu0 }
 0x165   :  { %v3183_v28 = vadd.f32 %v3182_v35, %v3181_v10  ;;  %v3184_v6 = vpop.f32.mrb[30].mxu0  ;;  %3734 = vmatmul.mubr.f32.gmra.mrb[12].mxu1 %v4944_v9  ;;  %v935_v13 = vsub.f32 %v4939_v60, %v5463_v27  ;;  %v5465_v5 = vand.u32 4294901760, %v4944_v9  ;;  %v4962_v10 = vpack.c.bf16 %v1240_v8, %v1233_v37 }
 0x166   :  { %v3185_v24 = vpop.f32.mrb[31].mxu0 }
 0x167   :  { %v4953_v36 = vand.u32 4294901760, %v3183_v28  ;;  %v3186_v63 = vadd.f32 %v3185_v24, %v3184_v6  ;;  %v936_v48 = vand.u32 4294901760, %v935_v13  ;;  %v945_v55 = vsub.f32 %v4944_v9, %v5465_v5 }
 0x169   :  { %v4965_v35 = vsub.f32 %v3183_v28, %v4953_v36  ;;  %v4967_v27 = vand.u32 4294901760, %v3186_v63  ;;  %3573 = vmatprep.mubr.f32.mxu0 %v936_v48  ;;  %v946_v62 = vand.u32 4294901760, %v945_v55 }
 0x16b   :  { %v4970_v6 = vsub.f32 %v3186_v63, %v4967_v27  ;;  %v3187_v13 = vpop.f32.mrb[32].mxu0  ;;  %3574 = vmatmul.mubr.f32.gmra.mrb[76].mxu0 %v946_v62  ;;  %3736 = vmatprep.mubr.f32.mxu1 %v4965_v35  ;;  %v5467_v44 = vand.u32 4294901760, %v4965_v35 }
 0x16c   :  { %v3188_v24 = vpop.f32.mrb[33].mxu0 }
 0x16d   :  { %v3189_v45 = vadd.f32 %v3188_v24, %v3187_v13  ;;  %v3190_v37 = vpop.f32.mrb[34].mxu0  ;;  %3737 = vmatmul.mubr.f32.gmra.mrb[14].mxu1 %v4970_v6  ;;  %v955_v8 = vsub.f32 %v4965_v35, %v5467_v44  ;;  %v5470_v55 = vand.u32 4294901760, %v4970_v6 }
 0x16e   :  { %v3191_v28 = vpop.f32.mrb[35].mxu0 }
 0x16f   :  { %v4979_v63 = vand.u32 4294901760, %v3189_v45  ;;  %v3192_v48 = vadd.f32 %v3191_v28, %v3190_v37  ;;  %v956_v62 = vand.u32 4294901760, %v955_v8  ;;  %v965_v5 = vsub.f32 %v4970_v6, %v5470_v55 }
 0x171   :  { %v4985_v13 = vsub.f32 %v3189_v45, %v4979_v63  ;;  %v4987_v24 = vand.u32 4294901760, %v3192_v48  ;;  %3576 = vmatprep.mubr.f32.mxu0 %v956_v62  ;;  %v966_v42 = vand.u32 4294901760, %v965_v5 }
 0x173   :  { %v4990_v44 = vsub.f32 %v3192_v48, %v4987_v24  ;;  %v3193_v31 = vpop.f32.mrb[36].mxu0  ;;  %3577 = vmatmul.mubr.f32.gmra.mrb[78].mxu0 %v966_v42  ;;  %3739 = vmatprep.mubr.f32.mxu1 %v4985_v13  ;;  %v5474_v37 = vand.u32 4294901760, %v4985_v13 }
 0x174   :  { %v3194_v8 = vpop.f32.mrb[37].mxu0 }
 0x175   :  { %v3195_v28 = vadd.f32 %v3194_v8, %v3193_v31  ;;  %v3196_v32 = vpop.f32.mrb[38].mxu0  ;;  %3740 = vmatmul.mubr.f32.gmra.mrb[16].mxu1 %v4990_v44  ;;  %v975_v45 = vsub.f32 %v4985_v13, %v5474_v37  ;;  %v5479_v5 = vand.u32 4294901760, %v4990_v44 }
 0x176   :  { %v3197_v62 = vpop.f32.mrb[39].mxu0 }
 0x177   :  { %v4999_v48 = vand.u32 4294901760, %v3195_v28  ;;  %v3198_v55 = vadd.f32 %v3197_v62, %v3196_v32  ;;  %v976_v42 = vand.u32 4294901760, %v975_v45  ;;  %v985_v26 = vsub.f32 %v4990_v44, %v5479_v5 }
 0x179   :  { %5537 = vst [vmem:[#allocation20_spill] sm:$0xff] %v4999_v48  ;;  %v5005_v31 = vsub.f32 %v3195_v28, %v4999_v48  ;;  %v5007_v8 = vand.u32 4294901760, %v3198_v55  ;;  %3579 = vmatprep.mubr.f32.mxu0 %v976_v42  ;;  %v986_v51 = vand.u32 4294901760, %v985_v26 }
 0x17b   :  { %5538 = vst [vmem:[#allocation21_spill] sm:$0xff] %v5007_v8  ;;  %v5010_v37 = vsub.f32 %v3198_v55, %v5007_v8  ;;  %v3199_v47 = vpop.f32.mrb[40].mxu0  ;;  %3580 = vmatmul.mubr.f32.gmra.mrb[80].mxu0 %v986_v51  ;;  %3742 = vmatprep.mubr.f32.mxu1 %v5005_v31  ;;  %v5484_v32 = vand.u32 4294901760, %v5005_v31 }
 0x17c   :  { %v3200_v45 = vpop.f32.mrb[41].mxu0 }
 0x17d   :  { %v3201_v62 = vadd.f32 %v3200_v45, %v3199_v47  ;;  %v3202_v7 = vpop.f32.mrb[42].mxu0  ;;  %3743 = vmatmul.mubr.f32.gmra.mrb[18].mxu1 %v5010_v37  ;;  %v995_v28 = vsub.f32 %v5005_v31, %v5484_v32  ;;  %v5489_v26 = vand.u32 4294901760, %v5010_v37 }
 0x17e   :  { %v3203_v42 = vpop.f32.mrb[43].mxu0 }
 0x17f   :  { %v5019_v55 = vand.u32 4294901760, %v3201_v62  ;;  %v3204_v5 = vadd.f32 %v3203_v42, %v3202_v7  ;;  %v996_v51 = vand.u32 4294901760, %v995_v28  ;;  %v1005_v1 = vsub.f32 %v5010_v37, %v5489_v26 }
 0x181   :  { %5539 = vst [vmem:[#allocation22_spill] sm:$0xff] %v5019_v55  ;;  %v5025_v47 = vsub.f32 %v3201_v62, %v5019_v55  ;;  %v5027_v45 = vand.u32 4294901760, %v3204_v5  ;;  %3582 = vmatprep.mubr.f32.mxu0 %v996_v51  ;;  %v1006_v59 = vand.u32 4294901760, %v1005_v1 }
 0x183   :  { %5540 = vst [vmem:[#allocation23_spill] sm:$0xff] %v5027_v45  ;;  %v5030_v32 = vsub.f32 %v3204_v5, %v5027_v45  ;;  %v3205_v49 = vpop.f32.mrb[44].mxu0  ;;  %3583 = vmatmul.mubr.f32.gmra.mrb[82].mxu0 %v1006_v59  ;;  %3745 = vmatprep.mubr.f32.mxu1 %v5025_v47  ;;  %v5494_v7 = vand.u32 4294901760, %v5025_v47 }
 0x184   :  { %v3206_v28 = vpop.f32.mrb[45].mxu0 }
 0x185   :  { %5541 = vst [vmem:[#allocation24_spill] sm:$0xff] %v5030_v32  ;;  %v3207_v42 = vadd.f32 %v3206_v28, %v3205_v49  ;;  %v3208_v38 = vpop.f32.mrb[46].mxu0  ;;  %3746 = vmatmul.mubr.f32.gmra.mrb[20].mxu1 %v5030_v32  ;;  %v1015_v62 = vsub.f32 %v5025_v47, %v5494_v7  ;;  %v5499_v1 = vand.u32 4294901760, %v5030_v32 }
 0x186   :  { %v3209_v51 = vpop.f32.mrb[47].mxu0 }
 0x187   :  { %v5039_v5 = vand.u32 4294901760, %v3207_v42  ;;  %v3210_v26 = vadd.f32 %v3209_v51, %v3208_v38  ;;  %v1016_v59 = vand.u32 4294901760, %v1015_v62  ;;  %v1025_v45 = vsub.f32 %v5030_v32, %v5499_v1 }
 0x189   :  { %5542 = vst [vmem:[#allocation25_spill] sm:$0xff] %v5039_v5  ;;  %v5045_v49 = vsub.f32 %v3207_v42, %v5039_v5  ;;  %v5047_v28 = vand.u32 4294901760, %v3210_v26  ;;  %3585 = vmatprep.mubr.f32.mxu0 %v1016_v59  ;;  %v1026_v55 = vand.u32 4294901760, %v1025_v45 }
 0x18b   :  { %5543 = vst [vmem:[#allocation26_spill] sm:$0xff] %v5045_v49  ;;  %5544 = vst [vmem:[#allocation27_spill] sm:$0xff] %v5047_v28  ;;  %v5050_v7 = vsub.f32 %v3210_v26, %v5047_v28  ;;  %v3211_v8 = vpop.f32.mrb[48].mxu0  ;;  %3586 = vmatmul.mubr.f32.gmra.mrb[84].mxu0 %v1026_v55  ;;  %3748 = vmatprep.mubr.f32.mxu1 %v5045_v49  ;;  %v5504_v38 = vand.u32 4294901760, %v5045_v49 }
 0x18c   :  { %v3212_v62 = vpop.f32.mrb[49].mxu0 }
 0x18d   :  { %5545 = vst [vmem:[#allocation28_spill] sm:$0xff] %v5050_v7  ;;  %v3213_v51 = vadd.f32 %v3212_v62, %v3211_v8  ;;  %v3214_v48 = vpop.f32.mrb[50].mxu0  ;;  %3749 = vmatmul.mubr.f32.gmra.mrb[22].mxu1 %v5050_v7  ;;  %v1035_v42 = vsub.f32 %v5045_v49, %v5504_v38  ;;  %v5507_v45 = vand.u32 4294901760, %v5050_v7 }
 0x18e   :  { %v3215_v59 = vpop.f32.mrb[51].mxu0 }
 0x18f   :  { %v5059_v26 = vand.u32 4294901760, %v3213_v51  ;;  %v3216_v1 = vadd.f32 %v3215_v59, %v3214_v48  ;;  %v1036_v55 = vand.u32 4294901760, %v1035_v42  ;;  %v1045_v28 = vsub.f32 %v5050_v7, %v5507_v45 }
 0x191   :  { %5546 = vst [vmem:[#allocation29_spill] sm:$0xff] %v5059_v26  ;;  %v5065_v8 = vsub.f32 %v3213_v51, %v5059_v26  ;;  %v5067_v62 = vand.u32 4294901760, %v3216_v1  ;;  %3588 = vmatprep.mubr.f32.mxu0 %v1036_v55  ;;  %v1046_v5 = vand.u32 4294901760, %v1045_v28 }
 0x193   :  { %5547 = vst [vmem:[#allocation30_spill] sm:$0xff] %v5065_v8  ;;  %5548 = vst [vmem:[#allocation31_spill] sm:$0xff] %v5067_v62  ;;  %v5070_v38 = vsub.f32 %v3216_v1, %v5067_v62  ;;  %v3217_v49 = vpop.f32.mrb[52].mxu0  ;;  %3589 = vmatmul.mubr.f32.gmra.mrb[86].mxu0 %v1046_v5  ;;  %3751 = vmatprep.mubr.f32.mxu1 %v5065_v8  ;;  %v5512_v48 = vand.u32 4294901760, %v5065_v8 }
 0x194   :  { %v3218_v42 = vpop.f32.mrb[53].mxu0 }
 0x195   :  { %5549 = vst [vmem:[#allocation32_spill] sm:$0xff] %v5070_v38  ;;  %v3219_v59 = vadd.f32 %v3218_v42, %v3217_v49  ;;  %v3220_v32 = vpop.f32.mrb[54].mxu0  ;;  %3752 = vmatmul.mubr.f32.gmra.mrb[24].mxu1 %v5070_v38  ;;  %v1055_v51 = vsub.f32 %v5065_v8, %v5512_v48  ;;  %v5515_v28 = vand.u32 4294901760, %v5070_v38 }
 0x196   :  { %v3221_v55 = vpop.f32.mrb[55].mxu0 }
 0x197   :  { %v5079_v1 = vand.u32 4294901760, %v3219_v59  ;;  %v3222_v45 = vadd.f32 %v3221_v55, %v3220_v32  ;;  %v1056_v5 = vand.u32 4294901760, %v1055_v51  ;;  %v1065_v62 = vsub.f32 %v5070_v38, %v5515_v28 }
 0x199   :  { %5550 = vst [vmem:[#allocation33_spill] sm:$0xff] %v5079_v1  ;;  %v5085_v49 = vsub.f32 %v3219_v59, %v5079_v1  ;;  %v5087_v42 = vand.u32 4294901760, %v3222_v45  ;;  %3591 = vmatprep.mubr.f32.mxu0 %v1056_v5  ;;  %v1066_v26 = vand.u32 4294901760, %v1065_v62 }
 0x19b   :  { %5551 = vst [vmem:[#allocation34_spill] sm:$0xff] %v5085_v49  ;;  %5552 = vst [vmem:[#allocation35_spill] sm:$0xff] %v5087_v42  ;;  %v5090_v48 = vsub.f32 %v3222_v45, %v5087_v42  ;;  %v3223_v8 = vpop.f32.mrb[56].mxu0  ;;  %3592 = vmatmul.mubr.f32.gmra.mrb[88].mxu0 %v1066_v26  ;;  %3754 = vmatprep.mubr.f32.mxu1 %v5085_v49  ;;  %v5520_v32 = vand.u32 4294901760, %v5085_v49 }
 0x19c   :  { %v3224_v51 = vpop.f32.mrb[57].mxu0 }
 0x19d   :  { %v3225_v55 = vadd.f32 %v3224_v51, %v3223_v8  ;;  %v3226_v7 = vpop.f32.mrb[58].mxu0  ;;  %3755 = vmatmul.mubr.f32.gmra.mrb[26].mxu1 %v5090_v48  ;;  %v1075_v59 = vsub.f32 %v5085_v49, %v5520_v32  ;;  %v5523_v62 = vand.u32 4294901760, %v5090_v48 }
 0x19e   :  { %v3227_v5 = vpop.f32.mrb[59].mxu0 }
 0x19f   :  { %v5099_v45 = vand.u32 4294901760, %v3225_v55  ;;  %v3228_v28 = vadd.f32 %v3227_v5, %v3226_v7  ;;  %v1076_v26 = vand.u32 4294901760, %v1075_v59  ;;  %v1085_v42 = vsub.f32 %v5090_v48, %v5523_v62 }
 0x1a1   :  { %5553 = vst [vmem:[#allocation36_spill] sm:$0xff] %v5099_v45  ;;  %v5105_v8 = vsub.f32 %v3225_v55, %v5099_v45  ;;  %v5107_v51 = vand.u32 4294901760, %v3228_v28  ;;  %3594 = vmatprep.mubr.f32.mxu0 %v1076_v26  ;;  %v1086_v1 = vand.u32 4294901760, %v1085_v42 }
 0x1a3   :  { %5554 = vst [vmem:[#allocation37_spill] sm:$0xff] %v5107_v51  ;;  %v5110_v32 = vsub.f32 %v3228_v28, %v5107_v51  ;;  %v3229_v49 = vpop.f32.mrb[60].mxu0  ;;  %3595 = vmatmul.mubr.f32.gmra.mrb[90].mxu0 %v1086_v1  ;;  %3757 = vmatprep.mubr.f32.mxu1 %v5105_v8  ;;  %v5528_v7 = vand.u32 4294901760, %v5105_v8 }
 0x1a4   :  { %v3230_v59 = vpop.f32.mrb[61].mxu0 }
 0x1a5   :  { %v3231_v5 = vadd.f32 %v3230_v59, %v3229_v49  ;;  %v3232_v38 = vpop.f32.mrb[62].mxu0  ;;  %3758 = vmatmul.mubr.f32.gmra.mrb[28].mxu1 %v5110_v32  ;;  %v1095_v55 = vsub.f32 %v5105_v8, %v5528_v7  ;;  %v5529_v42 = vand.u32 4294901760, %v5110_v32 }
 0x1a6   :  { %v3233_v26 = vpop.f32.mrb[63].mxu0 }
 0x1a7   :  { %v5119_v28 = vand.u32 4294901760, %v3231_v5  ;;  %v3234_v62 = vadd.f32 %v3233_v26, %v3232_v38  ;;  %v1096_v1 = vand.u32 4294901760, %v1095_v55  ;;  %v1105_v51 = vsub.f32 %v5110_v32, %v5529_v42 }
 0x1a8   :  { %v5555_v26 = vand.u32 4294901760, %v4724_v21  ;;  %v5557_v42 = vand.u32 4294901760, %v4761_v11  ;;  %v5558_v21 = vand.u32 4294901760, %v4775_v15  ;;  %v5563_v11 = vand.u32 4294901760, %v4885_v50 }
 0x1a9   :  { %v5125_v49 = vsub.f32 %v3231_v5, %v5119_v28  ;;  %v5127_v59 = vand.u32 4294901760, %v3234_v62  ;;  %3597 = vmatprep.mubr.f32.mxu0 %v1096_v1  ;;  %v1106_v45 = vand.u32 4294901760, %v1105_v51  ;;  %v5564_v15 = vand.u32 4294901760, %v4891_v29 }
 0x1aa   :  { %v5572_v50 = vand.u32 4294901760, %v4990_v44  ;;  %v5573_v29 = vand.u32 4294901760, %v5005_v31  ;;  %v5583_v44 = vld [vmem:[#allocation28_spill] sm:$0xff] }
 0x1ab   :  { %v5130_v7 = vsub.f32 %v3234_v62, %v5127_v59  ;;  %3598 = vmatmul.mubr.f32.gmra.mrb[92].mxu0 %v1106_v45  ;;  %3760 = vmatprep.mubr.f32.mxu1 %v5125_v49  ;;  %v1114_v38 = vand.u32 4294901760, %v5125_v49  ;;  %v5556_v45 = vand.u32 4294901760, %v4732_v40  ;;  %v5561_v40 = vand.u32 4294901760, %v4852_v30 }
 0x1ac   :  { %v5569_v30 = vand.u32 4294901760, %v4965_v35  ;;  %v5581_v35 = vld [vmem:[#allocation21_spill] sm:$0xff] }
 0x1ad   :  { %3761 = vmatmul.mubr.f32.gmra.mrb[30].mxu1 %v5130_v7  ;;  %v1115_v55 = vsub.f32 %v5125_v49, %v1114_v38  ;;  %v1124_v5 = vand.u32 4294901760, %v5130_v7  ;;  %v5607_v49 = vld [vmem:[#allocation17_spill] sm:$0xff] }
 0x1ae   :  { %3795 = vmatprep.mubr.f32.mxu1 %v5555_v26  ;;  %v5589_v26 = vld [vmem:[#allocation32_spill] sm:$0xff] }
 0x1af   :  { %v1116_v51 = vand.u32 4294901760, %v1115_v55  ;;  %v1125_v62 = vsub.f32 %v5130_v7, %v1124_v5  ;;  %v5559_v55 = vand.u32 4294901760, %v4811_v16  ;;  %v5566_v16 = vand.u32 4294901760, %v4918_v2  ;;  %v5576_v2 = vld [vmem:[#allocation20_spill] sm:$0xff] }
 0x1b0   :  { %v5606_v7 = vld [vmem:[#allocation16_spill] sm:$0xff] }
 0x1b1   :  { %3600 = vmatprep.mubr.f32.mxu0 %v1116_v51  ;;  %3796 = vmatmul.mubr.f32.vlgmr.msra.gmra.mrb[0].mxu1 %v5556_v45  ;;  %v1126_v1 = vand.u32 4294901760, %v1125_v62  ;;  %v5590_v51 = vand.u32 4294901760, %v5589_v26  ;;  %v5591_v62 = vld [vmem:[#allocation34_spill] sm:$0xff] }
 0x1b2   :  { %4134 = vmatpush3.bf16.msra.mxu1 %v4718_v17  ;;  %3798 = vmatprep.mubr.f32.mxu1 %v5557_v42  ;;  %v5560_v17 = vand.u32 4294901760, %v4817_v41  ;;  %v5567_v41 = vand.u32 4294901760, %v4939_v60  ;;  %v5588_v42 = vld [vmem:[#allocation25_spill] sm:$0xff]  ;;  %v5592_v45 = vand.u32 4294901760, %v5591_v62 }
 0x1b3   :  { %3601 = vmatmul.mubr.f32.gmra.mrb[94].mxu0 %v1126_v1  ;;  %4136 = vmatprep.subr.bf16.mxu1 %v4758_v3  ;;  %v5593_v1 = vld [vmem:[#allocation27_spill] sm:$0xff] }
 0x1b4   :  { %3635 = vmatprep.mubr.f32.mxu0 %v4720_v18 }
 0x1b5   :  { %3799 = vmatmul.mubr.f32.gmra.mrb[2].mxu1 %v5558_v21  ;;  %v5594_v21 = vld [vmem:[#allocation29_spill] sm:$0xff] }
 0x1b6   :  { %3801 = vmatprep.mubr.f32.mxu1 %v5559_v55  ;;  %4138 = vmatpush3.bf16.msra.mxu1 %v4758_v3  ;;  %v5562_v3 = vand.u32 4294901760, %v4861_v53  ;;  %v5570_v53 = vand.u32 4294901760, %v4970_v6  ;;  %v5582_v6 = vld [vmem:[#allocation22_spill] sm:$0xff]  ;;  %v5595_v55 = vand.u32 4294901760, %v5090_v48  ;;  %v5602_v48 = vld [vmem:[#allocation37_spill] sm:$0xff] }
 0x1b7   :  { %3636 = vmatmul.mubr.f32.vlgmr.msra.gmra.mrb[64].mxu0 %v4726_v22  ;;  %4140 = vmatprep.subr.bf16.mxu1 %v4808_v14 }
 0x1b8   :  { %3638 = vmatprep.mubr.f32.mxu0 %v4751_v57 }
 0x1b9   :  { %3802 = vmatmul.mubr.f32.gmra.mrb[4].mxu1 %v5560_v17  ;;  %v5596_v17 = vand.u32 4294901760, %v5105_v8  ;;  %v5604_v8 = vld [vmem:[#allocation14_spill] sm:$0xff] }
 0x1ba   :  { %3804 = vmatprep.mubr.f32.mxu1 %v5561_v40  ;;  %4142 = vmatpush3.bf16.msra.mxu1 %v4808_v14  ;;  %v5565_v14 = vand.u32 4294901760, %v4913_v46  ;;  %v5575_v46 = vand.u32 4294901760, %v5025_v47  ;;  %v5587_v47 = vld [vmem:[#allocation23_spill] sm:$0xff] }
 0x1bb   :  { %3639 = vmatmul.mubr.f32.gmra.mrb[66].mxu0 %v4763_v12  ;;  %4144 = vmatprep.subr.bf16.mxu1 %v4849_v39  ;;  %v5597_v40 = vld [vmem:[#allocation31_spill] sm:$0xff] }
 0x1bc   :  { %3641 = vmatprep.mubr.f32.mxu0 %v4796_v56 }
 0x1bd   :  { %3805 = vmatmul.mubr.f32.gmra.mrb[6].mxu1 %v5562_v3  ;;  %v5598_v3 = vld [vmem:[#allocation33_spill] sm:$0xff] }
 0x1be   :  { %3807 = vmatprep.mubr.f32.mxu1 %v5563_v11  ;;  %4146 = vmatpush3.bf16.msra.mxu1 %v4849_v39  ;;  %v5568_v39 = vand.u32 4294901760, %v4944_v9  ;;  %v5579_v9 = vld [vmem:[#allocation26_spill] sm:$0xff]  ;;  %v5599_v11 = vand.u32 4294901760, %v5110_v32  ;;  %v5603_v32 = vld [vmem:[#allocation13_spill] sm:$0xff] }
 0x1bf   :  { %3642 = vmatmul.mubr.f32.gmra.mrb[68].mxu0 %v4813_v19  ;;  %4148 = vmatprep.subr.bf16.mxu1 %v4882_v43 }
 0x1c0   :  { %3644 = vmatprep.mubr.f32.mxu0 %v4836_v0 }
 0x1c1   :  { %3808 = vmatmul.mubr.f32.gmra.mrb[8].mxu1 %v5564_v15  ;;  %v5600_v15 = vld [vmem:[#allocation35_spill] sm:$0xff] }
 0x1c2   :  { %3810 = vmatprep.mubr.f32.mxu1 %v5565_v14  ;;  %4150 = vmatpush3.bf16.msra.mxu1 %v4882_v43  ;;  %v5571_v43 = vand.u32 4294901760, %v4985_v13  ;;  %v5584_v13 = vand.u32 4294901760, %v5583_v44  ;;  %v5601_v14 = vld [vmem:[#allocation36_spill] sm:$0xff] }
 0x1c3   :  { %3645 = vmatmul.mubr.f32.gmra.mrb[70].mxu0 %v4854_v52  ;;  %4152 = vmatprep.subr.bf16.mxu1 %v4910_v34 }
 0x1c4   :  { %3647 = vmatprep.mubr.f32.mxu0 %v4872_v23 }
 0x1c5   :  { %3811 = vmatmul.mubr.f32.gmra.mrb[10].mxu1 %v5566_v16 }
 0x1c6   :  { %3813 = vmatprep.mubr.f32.mxu1 %v5567_v41  ;;  %4154 = vmatpush3.bf16.msra.mxu1 %v4910_v34  ;;  %v5574_v34 = vand.u32 4294901760, %v5010_v37  ;;  %v5585_v37 = vld [vmem:[#allocation30_spill] sm:$0xff] }
 0x1c7   :  { %3648 = vmatmul.mubr.f32.gmra.mrb[72].mxu0 %v4887_v54  ;;  %4156 = vmatprep.subr.bf16.mxu1 %v4936_v25  ;;  %v5586_v31 = vand.u32 4294901760, %v5585_v37 }
 0x1c8   :  { %3650 = vmatprep.mubr.f32.mxu0 %v4901_v58 }
 0x1c9   :  { %3814 = vmatmul.mubr.f32.gmra.mrb[12].mxu1 %v5568_v39 }
 0x1ca   :  { %3816 = vmatprep.mubr.f32.mxu1 %v5569_v30  ;;  %4158 = vmatpush3.bf16.msra.mxu1 %v4936_v25  ;;  %v5577_v25 = vld [vmem:[#allocation24_spill] sm:$0xff] }
 0x1cb   :  { %3651 = vmatmul.mubr.f32.gmra.mrb[74].mxu0 %v4915_v61  ;;  %4160 = vmatprep.subr.bf16.mxu1 %v4962_v10  ;;  %v5578_v60 = vand.u32 4294901760, %v5577_v25 }
 0x1cc   :  { %3653 = vmatprep.mubr.f32.mxu0 %v4927_v20 }
 0x1cd   :  { %3817 = vmatmul.mubr.f32.gmra.mrb[14].mxu1 %v5570_v53 }
 0x1ce   :  { %3819 = vmatprep.mubr.f32.mxu1 %v5571_v43  ;;  %4162 = vmatpush3.bf16.msra.mxu1 %v4962_v10  ;;  %v5580_v10 = vand.u32 4294901760, %v5579_v9 }
 0x1cf   :  { %3654 = vmatmul.mubr.f32.gmra.mrb[76].mxu0 %v4941_v4  ;;  %4164 = vmatprep.subr.bf16.mxu1 %v4625_v33 }
 0x1d0   :  { %3656 = vmatprep.mubr.f32.mxu0 %v4953_v36 }
 0x1d1   :  { %3820 = vmatmul.mubr.f32.gmra.mrb[16].mxu1 %v5572_v50 }
 0x1d2   :  { %3822 = vmatprep.mubr.f32.mxu1 %v5573_v29 }
 0x1d3   :  { %3657 = vmatmul.mubr.f32.gmra.mrb[78].mxu0 %v4967_v27 }
 0x1d4   :  { %3659 = vmatprep.mubr.f32.mxu0 %v4979_v63 }
 0x1d5   :  { %3823 = vmatmul.mubr.f32.gmra.mrb[18].mxu1 %v5574_v34 }
 0x1d6   :  { %3825 = vmatprep.mubr.f32.mxu1 %v5575_v46 }
 0x1d7   :  { %3660 = vmatmul.mubr.f32.gmra.mrb[80].mxu0 %v4987_v24 }
 0x1d8   :  { %3662 = vmatprep.mubr.f32.mxu0 %v5576_v2 }
 0x1d9   :  { %3826 = vmatmul.mubr.f32.gmra.mrb[20].mxu1 %v5578_v60  ;;  %v5380_v60 = vld [vmem:[%s5454_s3] ss:$0 sm:$0xff]  ;;  %s4560_s3 = smov [#allocation9]  }
 0x1da   :  { %3828 = vmatprep.mubr.f32.mxu1 %v5580_v10  ;;  %s2902_s30 = sshll.u32 %s4560_s3, 4  ;;  %s2903_s30 = int_to_ptr.vmem [resolvable:$true] %s2902_s30 }
 0x1db   :  { %3663 = vmatmul.mubr.f32.gmra.mrb[82].mxu0 %v5581_v35  ;;  %s4525_s5 = scalar_lea.vmem %s2903_s30, 2048  ;;  %p4530_p11 = scmp.lt.s32.totalorder %s2903_s30, %s2903_s30 }
 0x1dc   :  { %3665 = vmatprep.mubr.f32.mxu0 %v5582_v6  ;;  %p4526_p10 = scmp.ne.s32.totalorder %s2903_s30, %s4525_s5  ;;  %p4531_p12 = scmp.lt.s32.totalorder %s4525_s5, %s4525_s5 }
 0x1dd   :  { %3829 = vmatmul.mubr.f32.gmra.mrb[22].mxu1 %v5584_v13 }
 0x1de   :  { %3831 = vmatprep.mubr.f32.mxu1 %v5586_v31  ;;  %p4532_p13 = por %p4531_p12, %p4530_p11 }
 0x1df   :  { %3666 = vmatmul.mubr.f32.gmra.mrb[84].mxu0 %v5587_v47 }
 0x1e0   :  { %3668 = vmatprep.mubr.f32.mxu0 %v5588_v42  ;;  %p4533_p0 = pnand %p4532_p13, %p4526_p10 }
 0x1e1   :  { %3832 = vmatmul.mubr.f32.gmra.mrb[24].mxu1 %v5590_v51 }
 0x1e2   :  { %3834 = vmatprep.mubr.f32.mxu1 %v5592_v45 }
 0x1e3   :  { %3669 = vmatmul.mubr.f32.gmra.mrb[86].mxu0 %v5593_v1 }
 0x1e4   :  { %3671 = vmatprep.mubr.f32.mxu0 %v5594_v21 }
 0x1e5   :  { %3835 = vmatmul.mubr.f32.gmra.mrb[26].mxu1 %v5595_v55 }
 0x1e6   :  { %3837 = vmatprep.mubr.f32.mxu1 %v5596_v17 }
 0x1e7   :  { %3672 = vmatmul.mubr.f32.gmra.mrb[88].mxu0 %v5597_v40 }
 0x1e8   :  { %3674 = vmatprep.mubr.f32.mxu0 %v5598_v3 }
 0x1e9   :  { %3838 = vmatmul.mubr.f32.gmra.mrb[28].mxu1 %v5599_v11 }
 0x1ea   :  { %3840 = vmatprep.mubr.f32.mxu1 %v1114_v38  ;;  %v5608_v38 = vld [vmem:[#allocation18_spill] sm:$0xff] }
 0x1eb   :  { %3675 = vmatmul.mubr.f32.gmra.mrb[90].mxu0 %v5600_v15 }
 0x1ec   :  { %3677 = vmatprep.mubr.f32.mxu0 %v5601_v14 }
 0x1ed   :  { %3841 = vmatmul.mubr.f32.gmra.mrb[30].mxu1 %v1124_v5  ;;  %v5609_v5 = vld [vmem:[#allocation19_spill] sm:$0xff] }
 0x1ee   :  { %3875 = vmatprep.mubr.f32.mxu1 %v4720_v18 }
 0x1ef   :  { %3678 = vmatmul.mubr.f32.gmra.mrb[92].mxu0 %v5602_v48 }
 0x1f0   :  { %3680 = vmatprep.mubr.f32.mxu0 %v5119_v28 }
 0x1f1   :  { %3876 = vmatmul.mubr.f32.vlgmr.msra.gmra.mrb[0].mxu1 %v4726_v22 }
 0x1f2   :  { %4166 = vmatpush3.bf16.msra.mxu1 %v4625_v33  ;;  %3878 = vmatprep.mubr.f32.mxu1 %v4751_v57  ;;  %v5605_v33 = vld [vmem:[#allocation15_spill] sm:$0xff] }
 0x1f3   :  { %3681 = vmatmul.mubr.f32.gmra.mrb[94].mxu0 %v5127_v59  ;;  %4168 = vmatprep.subr.bf16.mxu1 %v5603_v32 }
 0x1f5   :  { %3879 = vmatmul.mubr.f32.gmra.mrb[2].mxu1 %v4763_v12 }
 0x1f6   :  { %3881 = vmatprep.mubr.f32.mxu1 %v4796_v56  ;;  %4170 = vmatpush3.bf16.msra.mxu1 %v5603_v32 }
 0x1f7   :  { %4172 = vmatprep.subr.bf16.mxu1 %v5604_v8 }
 0x1f9   :  { %3882 = vmatmul.mubr.f32.gmra.mrb[4].mxu1 %v4813_v19 }
 0x1fa   :  { %3884 = vmatprep.mubr.f32.mxu1 %v4836_v0  ;;  %4174 = vmatpush3.bf16.msra.mxu1 %v5604_v8 }
 0x1fb   :  { %4176 = vmatprep.subr.bf16.mxu1 %v5605_v33 }
 0x1fd   :  { %3885 = vmatmul.mubr.f32.gmra.mrb[6].mxu1 %v4854_v52 }
 0x1fe   :  { %3887 = vmatprep.mubr.f32.mxu1 %v4872_v23  ;;  %4178 = vmatpush3.bf16.msra.mxu1 %v5605_v33 }
 0x1ff   :  { %4180 = vmatprep.subr.bf16.mxu1 %v5606_v7 }
 0x201   :  { %3888 = vmatmul.mubr.f32.gmra.mrb[8].mxu1 %v4887_v54 }
 0x202   :  { %3890 = vmatprep.mubr.f32.mxu1 %v4901_v58  ;;  %4182 = vmatpush3.bf16.msra.mxu1 %v5606_v7 }
 0x203   :  { %4184 = vmatprep.subr.bf16.mxu1 %v5607_v49 }
 0x205   :  { %3891 = vmatmul.mubr.f32.gmra.mrb[10].mxu1 %v4915_v61 }
 0x206   :  { %3893 = vmatprep.mubr.f32.mxu1 %v4927_v20  ;;  %4186 = vmatpush3.bf16.msra.mxu1 %v5607_v49 }
 0x207   :  { %4188 = vmatprep.subr.bf16.mxu1 %v5608_v38 }
 0x209   :  { %3894 = vmatmul.mubr.f32.gmra.mrb[12].mxu1 %v4941_v4 }
 0x20a   :  { %3896 = vmatprep.mubr.f32.mxu1 %v4953_v36  ;;  %4190 = vmatpush3.bf16.msra.mxu1 %v5608_v38 }
 0x20b   :  { %4192 = vmatprep.subr.bf16.mxu1 %v5609_v5 }
 0x20d   :  { %3897 = vmatmul.mubr.f32.gmra.mrb[14].mxu1 %v4967_v27 }
 0x20e   :  { %3899 = vmatprep.mubr.f32.mxu1 %v4979_v63  ;;  %4194 = vmatpush3.bf16.msra.mxu1 %v5609_v5 }
 0x211   :  { %3900 = vmatmul.mubr.f32.gmra.mrb[16].mxu1 %v4987_v24 }
 0x212   :  { %3902 = vmatprep.mubr.f32.mxu1 %v5576_v2 }
 0x215   :  { %3903 = vmatmul.mubr.f32.gmra.mrb[18].mxu1 %v5581_v35 }
 0x216   :  { %3905 = vmatprep.mubr.f32.mxu1 %v5582_v6 }
 0x219   :  { %3906 = vmatmul.mubr.f32.gmra.mrb[20].mxu1 %v5587_v47 }
 0x21a   :  { %3908 = vmatprep.mubr.f32.mxu1 %v5588_v42 }
 0x21d   :  { %3909 = vmatmul.mubr.f32.gmra.mrb[22].mxu1 %v5593_v1 }
 0x21e   :  { %3911 = vmatprep.mubr.f32.mxu1 %v5594_v21 }
 0x221   :  { %3912 = vmatmul.mubr.f32.gmra.mrb[24].mxu1 %v5597_v40 }
 0x222   :  { %3914 = vmatprep.mubr.f32.mxu1 %v5598_v3 }
 0x225   :  { %3915 = vmatmul.mubr.f32.gmra.mrb[26].mxu1 %v5600_v15 }
 0x226   :  { %3917 = vmatprep.mubr.f32.mxu1 %v5601_v14 }
 0x229   :  { %3918 = vmatmul.mubr.f32.gmra.mrb[28].mxu1 %v5602_v48 }
 0x22a   :  { %3920 = vmatprep.mubr.f32.mxu1 %v5119_v28 }
 0x22d   :  { %3921 = vmatmul.mubr.f32.gmra.mrb[30].mxu1 %v5127_v59 }
 0x22e   :  { %3955 = vmatprep.mubr.f32.mxu1 %v4720_v18 }
 0x231   :  { %3956 = vmatmul.mubr.f32.vlgmr.msra.gmra.mrb[0].mxu1 %v4726_v22 }
 0x232   :  { %3958 = vmatprep.mubr.f32.mxu1 %v4751_v57 }
 0x235   :  { %3959 = vmatmul.mubr.f32.gmra.mrb[2].mxu1 %v4763_v12 }
 0x236   :  { %3961 = vmatprep.mubr.f32.mxu1 %v4796_v56 }
 0x239   :  { %3962 = vmatmul.mubr.f32.gmra.mrb[4].mxu1 %v4813_v19 }
 0x23a   :  { %3964 = vmatprep.mubr.f32.mxu1 %v4836_v0 }
 0x23d   :  { %3965 = vmatmul.mubr.f32.gmra.mrb[6].mxu1 %v4854_v52 }
 0x23e   :  { %3967 = vmatprep.mubr.f32.mxu1 %v4872_v23 }
 0x241   :  { %3968 = vmatmul.mubr.f32.gmra.mrb[8].mxu1 %v4887_v54 }
 0x242   :  { %3970 = vmatprep.mubr.f32.mxu1 %v4901_v58 }
 0x245   :  { %3971 = vmatmul.mubr.f32.gmra.mrb[10].mxu1 %v4915_v61 }
 0x246   :  { %3973 = vmatprep.mubr.f32.mxu1 %v4927_v20 }
 0x249   :  { %3974 = vmatmul.mubr.f32.gmra.mrb[12].mxu1 %v4941_v4 }
 0x24a   :  { %3976 = vmatprep.mubr.f32.mxu1 %v4953_v36 }
 0x24d   :  { %3977 = vmatmul.mubr.f32.gmra.mrb[14].mxu1 %v4967_v27 }
 0x24e   :  { %3979 = vmatprep.mubr.f32.mxu1 %v4979_v63 }
 0x251   :  { %3980 = vmatmul.mubr.f32.gmra.mrb[16].mxu1 %v4987_v24 }
 0x252   :  { %3982 = vmatprep.mubr.f32.mxu1 %v5576_v2 }
 0x255   :  { %3983 = vmatmul.mubr.f32.gmra.mrb[18].mxu1 %v5581_v35 }
 0x256   :  { %3985 = vmatprep.mubr.f32.mxu1 %v5582_v6 }
 0x259   :  { %3986 = vmatmul.mubr.f32.gmra.mrb[20].mxu1 %v5587_v47 }
 0x25a   :  { %3988 = vmatprep.mubr.f32.mxu1 %v5588_v42 }
 0x25d   :  { %3989 = vmatmul.mubr.f32.gmra.mrb[22].mxu1 %v5593_v1 }
 0x25e   :  { %3991 = vmatprep.mubr.f32.mxu1 %v5594_v21 }
 0x261   :  { %3992 = vmatmul.mubr.f32.gmra.mrb[24].mxu1 %v5597_v40 }
 0x262   :  { %3994 = vmatprep.mubr.f32.mxu1 %v5598_v3 }
 0x265   :  { %3995 = vmatmul.mubr.f32.gmra.mrb[26].mxu1 %v5600_v15 }
 0x266   :  { %3997 = vmatprep.mubr.f32.mxu1 %v5601_v14 }
 0x269   :  { %3998 = vmatmul.mubr.f32.gmra.mrb[28].mxu1 %v5602_v48 }
 0x26a   :  { %4000 = vmatprep.mubr.f32.mxu1 %v5119_v28 }
 0x26d   :  { %4001 = vmatmul.mubr.f32.gmra.mrb[30].mxu1 %v5127_v59 }
 0x28a   :  { %v3637_v18 = vpop.f32.mrb[64].mxu0 }
 0x28b   :  { %v1279_v22 = vpop.f32.mrb[65].mxu0  ;;  %v4195_v9 = vadd.f32 %v3637_v18, %v5380_v60 }
 0x28c   :  { %v4197_v10 = vadd.f32 %v5380_v60, %v1279_v22 }
 0x28e   :  { %v3640_v57 = vpop.f32.mrb[66].mxu0 }
 0x28f   :  { %v1291_v12 = vpop.f32.mrb[67].mxu0  ;;  %v4199_v37 = vadd.f32 %v3640_v57, %v5380_v60 }
 0x290   :  { %v4201_v47 = vadd.f32 %v5380_v60, %v1291_v12 }
 0x292   :  { %v3643_v56 = vpop.f32.mrb[68].mxu0 }
 0x293   :  { %v1303_v19 = vpop.f32.mrb[69].mxu0  ;;  %v4203_v21 = vadd.f32 %v3643_v56, %v5380_v60 }
 0x294   :  { %v4205_v17 = vadd.f32 %v5380_v60, %v1303_v19 }
 0x296   :  { %v3646_v23 = vpop.f32.mrb[70].mxu0 }
 0x297   :  { %v1315_v0 = vpop.f32.mrb[71].mxu0  ;;  %v4207_v32 = vadd.f32 %v3646_v23, %v5380_v60 }
 0x298   :  { %v4209_v33 = vadd.f32 %v5380_v60, %v1315_v0 }
 0x29a   :  { %v3649_v52 = vpop.f32.mrb[72].mxu0 }
 0x29b   :  { %v1327_v54 = vpop.f32.mrb[73].mxu0  ;;  %v4211_v57 = vadd.f32 %v3649_v52, %v5380_v60 }
 0x29c   :  { %v4213_v56 = vadd.f32 %v5380_v60, %v1327_v54 }
 0x29e   :  { %v5333_v58 = vpop.f32.mrb[74].mxu0 }
 0x29f   :  { %v5335_v61 = vpop.f32.mrb[75].mxu0  ;;  %v4215_v0 = vadd.f32 %v5333_v58, %v5380_v60 }
 0x2a2   :  { %v5337_v4 = vpop.f32.mrb[76].mxu0 }
 0x2a3   :  { %v5339_v20 = vpop.f32.mrb[77].mxu0 }
 0x2a6   :  { %v5341_v27 = vpop.f32.mrb[78].mxu0 }
 0x2a7   :  { %v5343_v36 = vpop.f32.mrb[79].mxu0 }
 0x2aa   :  { %v5345_v63 = vpop.f32.mrb[80].mxu0 }
 0x2ab   :  { %v5347_v24 = vpop.f32.mrb[81].mxu0 }
 0x2ae   :  { %v5349_v28 = vpop.f32.mrb[82].mxu0 }
 0x2af   :  { %v5351_v59 = vpop.f32.mrb[83].mxu0 }
 0x2b2   :  { %v5353_v16 = vpop.f32.mrb[84].mxu0 }
 0x2b3   :  { %v5355_v41 = vpop.f32.mrb[85].mxu0 }
 0x2b6   :  { %v5357_v39 = vpop.f32.mrb[86].mxu0 }
 0x2b7   :  { %v5359_v30 = vpop.f32.mrb[87].mxu0 }
 0x2ba   :  { %v5361_v53 = vpop.f32.mrb[88].mxu0 }
 0x2bb   :  { %v5363_v43 = vpop.f32.mrb[89].mxu0 }
 0x2be   :  { %v5365_v50 = vpop.f32.mrb[90].mxu0 }
 0x2bf   :  { %v5367_v29 = vpop.f32.mrb[91].mxu0 }
 0x2c2   :  { %v5369_v34 = vpop.f32.mrb[92].mxu0 }
 0x2c3   :  { %v5371_v46 = vpop.f32.mrb[93].mxu0 }
 0x2c6   :  { %v5373_v2 = vpop.f32.mrb[94].mxu0 }
 0x2c7   :  { %v5375_v25 = vpop.f32.mrb[95].mxu0 }
 0x304   :  { %v3957_v35 = vpop.f32.mrb[0].mxu1 }
 0x305   :  { %v4196_v6 = vadd.f32 %v4195_v9, %v3957_v35  ;;  %v2515_v44 = vpop.f32.mrb[1].mxu1 }
 0x306   :  { %v4198_v13 = vadd.f32 %v4197_v10, %v2515_v44 }
 0x307   :  { %v2706_v31 = vmax.f32 %v4196_v6, 0.0 }
 0x308   :  { %v2705_v42 = vmax.f32 %v4198_v13, 0.0  ;;  %v3960_v26 = vpop.f32.mrb[2].mxu1  ;;  %v4217_v13 = vadd.f32 %v5380_v60, %v5335_v61 }
 0x309   :  { %v4200_v51 = vadd.f32 %v4199_v37, %v3960_v26  ;;  %v2527_v62 = vpop.f32.mrb[3].mxu1  ;;  %v4219_v26 = vadd.f32 %v5337_v4, %v5380_v60 }
 0x30a   :  { %v3031_v45 = vpack.c.bf16 %v2706_v31, %v2705_v42  ;;  %v4202_v1 = vadd.f32 %v4201_v47, %v2527_v62  ;;  %v4221_v62 = vadd.f32 %v5380_v60, %v5339_v20 }
 0x30b   :  { %v2708_v55 = vmax.f32 %v4200_v51, 0.0 }
 0x30c   :  { %3032 = vst [vmem:[#allocation9] sm:$0xff] %v3031_v45   ;;  %v2707_v40 = vmax.f32 %v4202_v1, 0.0  ;;  %v3963_v3 = vpop.f32.mrb[4].mxu1 }
 0x30d   :  { %v4204_v11 = vadd.f32 %v4203_v21, %v3963_v3  ;;  %v2539_v15 = vpop.f32.mrb[5].mxu1  ;;  %v4225_v3 = vadd.f32 %v5380_v60, %v5343_v36 }
 0x30e   :  { %v3036_v14 = vpack.c.bf16 %v2708_v55, %v2707_v40  ;;  %v4206_v48 = vadd.f32 %v4205_v17, %v2539_v15  ;;  %v4223_v17 = vadd.f32 %v5341_v27, %v5380_v60 }
 0x30f   :  { %v2710_v8 = vmax.f32 %v4204_v11, 0.0 }
 0x310   :  { %3108 = vst [vmem:[#allocation9 + $0x8] sm:$0xff] %v3036_v14   ;;  %v2709_v7 = vmax.f32 %v4206_v48, 0.0  ;;  %v3966_v49 = vpop.f32.mrb[6].mxu1 }
 0x311   :  { %v4208_v38 = vadd.f32 %v4207_v32, %v3966_v49  ;;  %v2551_v5 = vpop.f32.mrb[7].mxu1  ;;  %v4227_v32 = vadd.f32 %v5345_v63, %v5380_v60 }
 0x312   :  { %v3041_v18 = vpack.c.bf16 %v2710_v8, %v2709_v7  ;;  %v4210_v22 = vadd.f32 %v4209_v33, %v2551_v5  ;;  %v4229_v33 = vadd.f32 %v5380_v60, %v5347_v24 }
 0x313   :  { %v2712_v12 = vmax.f32 %v4208_v38, 0.0 }
 0x314   :  { %3109 = vst [vmem:[#allocation9 + $0x10] sm:$0xff] %v3041_v18   ;;  %v2711_v19 = vmax.f32 %v4210_v22, 0.0  ;;  %v3969_v9 = vpop.f32.mrb[8].mxu1  ;;  %v4231_v18 = vadd.f32 %v5349_v28, %v5380_v60 }
 0x315   :  { %v4212_v10 = vadd.f32 %v4211_v57, %v3969_v9  ;;  %v2563_v23 = vpop.f32.mrb[9].mxu1  ;;  %v4233_v57 = vadd.f32 %v5380_v60, %v5351_v59 }
 0x316   :  { %v3046_v35 = vpack.c.bf16 %v2712_v12, %v2711_v19  ;;  %v4214_v6 = vadd.f32 %v4213_v56, %v2563_v23 }
 0x317   :  { %v2714_v44 = vmax.f32 %v4212_v10, 0.0  ;;  %v4235_v10 = vadd.f32 %v5353_v16, %v5380_v60 }
 0x318   :  { %3110 = vst [vmem:[#allocation9 + $0x18] sm:$0xff] %v3046_v35   ;;  %v2713_v37 = vmax.f32 %v4214_v6, 0.0  ;;  %v3972_v52 = vpop.f32.mrb[10].mxu1  ;;  %v4237_v35 = vadd.f32 %v5380_v60, %v5355_v41 }
 0x319   :  { %v4216_v31 = vadd.f32 %v4215_v0, %v3972_v52  ;;  %v2575_v47 = vpop.f32.mrb[11].mxu1 }
 0x31a   :  { %v3051_v54 = vpack.c.bf16 %v2714_v44, %v2713_v37  ;;  %v4218_v42 = vadd.f32 %v4217_v13, %v2575_v47  ;;  %v4239_v37 = vadd.f32 %v5357_v39, %v5380_v60 }
 0x31b   :  { %v2716_v51 = vmax.f32 %v4216_v31, 0.0  ;;  %v4241_v31 = vadd.f32 %v5380_v60, %v5359_v30 }
 0x31c   :  { %3111 = vst [vmem:[#allocation9 + $0x20] sm:$0xff] %v3051_v54   ;;  %v2715_v58 = vmax.f32 %v4218_v42, 0.0  ;;  %v3975_v45 = vpop.f32.mrb[12].mxu1 }
 0x31d   :  { %v4220_v1 = vadd.f32 %v4219_v26, %v3975_v45  ;;  %v2587_v21 = vpop.f32.mrb[13].mxu1 }
 0x31e   :  { %v3056_v61 = vpack.c.bf16 %v2716_v51, %v2715_v58  ;;  %v4222_v55 = vadd.f32 %v4221_v62, %v2587_v21  ;;  %v4243_v51 = vadd.f32 %v5361_v53, %v5380_v60  ;;  %v4245_v58 = vadd.f32 %v5380_v60, %v5363_v43 }
 0x31f   :  { %v2718_v40 = vmax.f32 %v4220_v1, 0.0 }
 0x320   :  { %3112 = vst [vmem:[#allocation9 + $0x28] sm:$0xff] %v3056_v61   ;;  %v2717_v4 = vmax.f32 %v4222_v55, 0.0  ;;  %v3978_v11 = vpop.f32.mrb[14].mxu1  ;;  %v4247_v55 = vadd.f32 %v5365_v50, %v5380_v60 }
 0x321   :  { %v4224_v15 = vadd.f32 %v4223_v17, %v3978_v11  ;;  %v2599_v14 = vpop.f32.mrb[15].mxu1 }
 0x322   :  { %v3061_v20 = vpack.c.bf16 %v2718_v40, %v2717_v4  ;;  %v4226_v48 = vadd.f32 %v4225_v3, %v2599_v14  ;;  %v4249_v40 = vadd.f32 %v5380_v60, %v5367_v29  ;;  %v4251_v14 = vadd.f32 %v5369_v34, %v5380_v60 }
 0x323   :  { %v2720_v8 = vmax.f32 %v4224_v15, 0.0 }
 0x324   :  { %3113 = vst [vmem:[#allocation9 + $0x30] sm:$0xff] %v3061_v20   ;;  %v2719_v27 = vmax.f32 %v4226_v48, 0.0  ;;  %v3981_v7 = vpop.f32.mrb[16].mxu1  ;;  %v4253_v48 = vadd.f32 %v5380_v60, %v5371_v46 }
 0x325   :  { %v4228_v49 = vadd.f32 %v4227_v32, %v3981_v7  ;;  %v2611_v38 = vpop.f32.mrb[17].mxu1  ;;  %v4255_v7 = vadd.f32 %v5373_v2, %v5380_v60 }
 0x326   :  { %v3066_v36 = vpack.c.bf16 %v2720_v8, %v2719_v27  ;;  %v4230_v5 = vadd.f32 %v4229_v33, %v2611_v38  ;;  %v4257_v38 = vadd.f32 %v5380_v60, %v5375_v25 }
 0x327   :  { %v2722_v22 = vmax.f32 %v4228_v49, 0.0 }
 0x328   :  { %3114 = vst [vmem:[#allocation9 + $0x38] sm:$0xff] %v3066_v36   ;;  %v2721_v63 = vmax.f32 %v4230_v5, 0.0  ;;  %v3984_v12 = vpop.f32.mrb[18].mxu1 }
 0x329   :  { %v4232_v56 = vadd.f32 %v4231_v18, %v3984_v12  ;;  %v2623_v19 = vpop.f32.mrb[19].mxu1 }
 0x32a   :  { %v3071_v24 = vpack.c.bf16 %v2722_v22, %v2721_v63  ;;  %v4234_v9 = vadd.f32 %v4233_v57, %v2623_v19 }
 0x32b   :  { %v2724_v23 = vmax.f32 %v4232_v56, 0.0 }
 0x32c   :  { %3115 = vst [vmem:[#allocation9 + $0x40] sm:$0xff] %v3071_v24   ;;  %v2723_v28 = vmax.f32 %v4234_v9, 0.0  ;;  %v3987_v6 = vpop.f32.mrb[20].mxu1 }
 0x32d   :  { %v4236_v0 = vadd.f32 %v4235_v10, %v3987_v6  ;;  %v2635_v44 = vpop.f32.mrb[21].mxu1 }
 0x32e   :  { %v3076_v59 = vpack.c.bf16 %v2724_v23, %v2723_v28  ;;  %v4238_v13 = vadd.f32 %v4237_v35, %v2635_v44 }
 0x32f   :  { %v2726_v52 = vmax.f32 %v4236_v0, 0.0 }
 0x330   :  { %3116 = vst [vmem:[#allocation9 + $0x48] sm:$0xff] %v3076_v59   ;;  %v2725_v16 = vmax.f32 %v4238_v13, 0.0  ;;  %v3990_v47 = vpop.f32.mrb[22].mxu1 }
 0x331   :  { %v4240_v54 = vadd.f32 %v4239_v37, %v3990_v47  ;;  %v2647_v42 = vpop.f32.mrb[23].mxu1 }
 0x332   :  { %v3081_v41 = vpack.c.bf16 %v2726_v52, %v2725_v16  ;;  %v4242_v26 = vadd.f32 %v4241_v31, %v2647_v42 }
 0x333   :  { %v2728_v62 = vmax.f32 %v4240_v54, 0.0 }
 0x334   :  { %3117 = vst [vmem:[#allocation9 + $0x50] sm:$0xff] %v3081_v41   ;;  %v2727_v39 = vmax.f32 %v4242_v26, 0.0  ;;  %v3993_v45 = vpop.f32.mrb[24].mxu1 }
 0x335   :  { %v4244_v1 = vadd.f32 %v4243_v51, %v3993_v45  ;;  %v2659_v21 = vpop.f32.mrb[25].mxu1 }
 0x336   :  { %v3086_v30 = vpack.c.bf16 %v2728_v62, %v2727_v39  ;;  %v4246_v61 = vadd.f32 %v4245_v58, %v2659_v21 }
 0x337   :  { %v2730_v17 = vmax.f32 %v4244_v1, 0.0 }
 0x338   :  { %3118 = vst [vmem:[#allocation9 + $0x58] sm:$0xff] %v3086_v30   ;;  %v2729_v53 = vmax.f32 %v4246_v61, 0.0  ;;  %v3996_v3 = vpop.f32.mrb[26].mxu1 }
 0x339   :  { %v4248_v4 = vadd.f32 %v4247_v55, %v3996_v3  ;;  %v2671_v11 = vpop.f32.mrb[27].mxu1 }
 0x33a   :  { %v3091_v43 = vpack.c.bf16 %v2730_v17, %v2729_v53  ;;  %v4250_v15 = vadd.f32 %v4249_v40, %v2671_v11 }
 0x33b   :  { %v2732_v20 = vmax.f32 %v4248_v4, 0.0 }
 0x33c   :  { %3119 = vst [vmem:[#allocation9 + $0x60] sm:$0xff] %v3091_v43   ;;  %v2731_v50 = vmax.f32 %v4250_v15, 0.0  ;;  %v3999_v32 = vpop.f32.mrb[28].mxu1 }
 0x33d   :  { %v4252_v8 = vadd.f32 %v4251_v14, %v3999_v32  ;;  %v2683_v33 = vpop.f32.mrb[29].mxu1 }
 0x33e   :  { %v3096_v29 = vpack.c.bf16 %v2732_v20, %v2731_v50  ;;  %v4254_v27 = vadd.f32 %v4253_v48, %v2683_v33 }
 0x33f   :  { %v2734_v49 = vmax.f32 %v4252_v8, 0.0 }
 0x340   :  { %3120 = vst [vmem:[#allocation9 + $0x68] sm:$0xff] %v3096_v29   ;;  %v2733_v34 = vmax.f32 %v4254_v27, 0.0  ;;  %v4002_v36 = vpop.f32.mrb[30].mxu1 }
 0x341   :  { %v4256_v5 = vadd.f32 %v4255_v7, %v4002_v36  ;;  %v2695_v18 = vpop.f32.mrb[31].mxu1 }
 0x342   :  { %v3101_v46 = vpack.c.bf16 %v2734_v49, %v2733_v34  ;;  %v4258_v22 = vadd.f32 %v4257_v38, %v2695_v18 }
 0x343   :  { %v2736_v57 = vmax.f32 %v4256_v5, 0.0 }
 0x344   :  { %3121 = vst [vmem:[#allocation9 + $0x70] sm:$0xff] %v3101_v46   ;;  %v2735_v63 = vmax.f32 %v4258_v22, 0.0 }
 0x346   :  { %v3106_v12 = vpack.c.bf16 %v2736_v57, %v2735_v63 }
 0x348   :  { %3122 = vst [vmem:[#allocation9 + $0x78] sm:$0xff] %v3106_v12  }
 0x349   :  { %4536 = shalt.err (!%p4533_p0)
}
 0x34a   :  { %s4537_s8 = scalar_lea.hbm %s5455_s4, 2048 }
 0x34b   :  { %p4538_p1 = scmp.ne.s32.totalorder %s5455_s4, %s4537_s8  ;;  %p4541_p2 = scmp.lt.u32.totalorder %s4537_s8, %s5455_s4 }
 0x34d   :  { %p4543_p3 = pnand %p4541_p2, %p4538_p1 }
 0x34f   :  { %4546 = shalt.err (!%p4543_p3)
}
 0x350   :  { %2908 = dma.vmem_to_hbm [thread:$0]  %s2903_s30, 2048, %s5455_s4, [#allocation5], %s4554_s25, %s4554_s25, %s4555_s26  }
 0x351   :  { %4551 = dma.done.wait [#allocation5], 2048  }
 0x352   :  { %4552 = vsyncadd [#allocation5], 4294965248 }
 0x353   :  { %2912 = vsyncpa [#allocation4], 1 }
 0x354   :  { %2913 = vsyncpa [#allocation7], 1 }
 0x355   :  { %2914 = vsyncpa [#allocation5], 1 }

</bundles_post_ra>
